<compile_context>
chip_gen: v6e
topology: v6e:2x2x1
jax: 0.10.0
libtpu: 0.0.40
codegen_flags: <defaults>
</compile_context>

<pallas_src>
import math

import jax
import jax.numpy as jnp
import numpy as np
from jax.experimental import pallas as pl
from jax.experimental.pallas import tpu as pltpu

# ---------------- synthetic config (small stand-in for jina-embeddings-v3) ----
B = 2            # batch
S = 8            # sequence length
H = 128          # hidden size
NH = 4           # attention heads
HD = H // NH     # head dim
F = 256          # MLP intermediate size
V = 64           # vocab size
R = 8            # LoRA rank
NUM_TASKS = 5
ADAPTATION_MAP = {   # mirrors encoder._adaptation_map
    'retrieval.query': 0,
    'retrieval.passage': 1,
    'separation': 2,
    'classification': 3,
    'text-matching': 4,
}
LORA_SCALE = 0.5
EPS = 1e-5
BS = B * S


def _layernorm(x, g, b):
    mu = jnp.mean(x, axis=-1, keepdims=True)
    var = jnp.mean(jnp.square(x - mu), axis=-1, keepdims=True)
    return (x - mu) * jax.lax.rsqrt(var + EPS) * g + b


# --------------------------------- kernel ------------------------------------
def encoder_layer_kernel(
    x_ref, bias_ref,
    wqkv_ref, wo_ref,
    w1_ref, b1_ref, w2_ref, b2_ref,
    ln1g_ref, ln1b_ref, ln2g_ref, ln2b_ref,
    out_ref,
    ctx_ref,            # VMEM scratch (BS, H) bf16 — per-head context written directly
):
    x = x_ref[...]                                  # (BS, H) f32
    xb = x.astype(jnp.bfloat16)

    # Fused Q|K|V projection (LoRA merged + softmax scale folded into Q columns
    # in the wrapper).
    qkv = jnp.dot(xb, wqkv_ref[...],
                  preferred_element_type=jnp.float32)        # (BS, 3H) f32 acc
    qkv_b = qkv.astype(jnp.bfloat16)                          # MXU operands

    bias = bias_ref[...]                             # (B, 1, S) f32 additive mask

    # Attention: batched over B via 3-D einsums, short unrolled loop over heads.
    for h in range(NH):
        lo = h * HD
        qh = qkv_b[:, lo:lo + HD].reshape(B, S, HD)
        kh = qkv_b[:, H + lo:H + lo + HD].reshape(B, S, HD)
        vh = qkv_b[:, 2 * H + lo:2 * H + lo + HD].reshape(B, S, HD)

        # scale already folded into Q weight columns -> no per-score multiply
        s = jnp.einsum('bqd,bkd->bqk', qh, kh,
                       preferred_element_type=jnp.float32) + bias   # (B,S,S) f32
        s = s - jnp.max(s, axis=-1, keepdims=True)
        p = jnp.exp(s)
        p = p * pl.reciprocal(jnp.sum(p, axis=-1, keepdims=True), approx=True)
        ch = jnp.einsum('bqk,bkd->bqd', p.astype(jnp.bfloat16), vh,
                        preferred_element_type=jnp.float32)         # (B,S,HD)
        # direct bf16 store into context scratch (no concatenates, no late cast)
        ctx_ref[:, lo:lo + HD] = ch.reshape(BS, HD).astype(jnp.bfloat16)

    attn = jnp.dot(ctx_ref[...], wo_ref[...],
                   preferred_element_type=jnp.float32)              # (BS, H) f32
    h1 = _layernorm(x + attn, ln1g_ref[...], ln1b_ref[...])         # f32

    m = jnp.dot(h1.astype(jnp.bfloat16), w1_ref[...],
                preferred_element_type=jnp.float32) + b1_ref[...]
    m = jax.nn.gelu(m, approximate=True)
    m = jnp.dot(m.astype(jnp.bfloat16), w2_ref[...],
                preferred_element_type=jnp.float32) + b2_ref[...]
    out_ref[...] = _layernorm(h1 + m, ln2g_ref[...], ln2b_ref[...]).astype(out_ref.dtype)


def _full_spec(shape):
    nd = len(shape)
    return pl.BlockSpec(shape, lambda i, _nd=nd: (0,) * _nd)


# --------------------------------- wrapper -----------------------------------
class JinaEmbeddingsV3WrapperPallas:
    """Synthetic JAX/Pallas stand-in for JinaEmbeddingsV3Wrapper.forward."""

    def __init__(self, key):
        ks = jax.random.split(key, 16)
        sc = 0.02
        n = lambda k, shp: (jax.random.normal(k, shp, jnp.float32) * sc)
        self.params = {
            'tok_emb': n(ks[0], (V, H)),
            'pos_emb': n(ks[1], (S, H)),
            'wq': n(ks[2], (H, H)), 'wk': n(ks[3], (H, H)),
            'wv': n(ks[4], (H, H)), 'wo': n(ks[5], (H, H)),
            # per-task LoRA banks (A: H->R, B: R->H), one adapter per task
            'la_q': n(ks[6], (NUM_TASKS, H, R)), 'lb_q': n(ks[7], (NUM_TASKS, R, H)),
            'la_k': n(ks[8], (NUM_TASKS, H, R)), 'lb_k': n(ks[9], (NUM_TASKS, R, H)),
            'la_v': n(ks[10], (NUM_TASKS, H, R)), 'lb_v': n(ks[11], (NUM_TASKS, R, H)),
            'w1': n(ks[12], (H, F)), 'b1': jnp.zeros((1, F), jnp.float32),
            'w2': n(ks[13], (F, H)), 'b2': jnp.zeros((1, H), jnp.float32),
            'ln1g': jnp.ones((1, H), jnp.float32), 'ln1b': jnp.zeros((1, H), jnp.float32),
            'ln2g': jnp.ones((1, H), jnp.float32), 'ln2b': jnp.zeros((1, H), jnp.float32),
        }
        # forward() always uses task 'retrieval.passage' for every example
        # (torch: adapter_mask = torch.full((num_examples,), task_id)), so the
        # LoRA adapter is uniform per batch and is merged into the base weights
        # once, outside the kernel.  QKV is additionally fused and the softmax
        # scale 1/sqrt(HD) is folded into the Q columns (one-time, at init).
        p = self.params
        tid = ADAPTATION_MAP['retrieval.passage']

        def merged(w, la, lb):
            return w + LORA_SCALE * jnp.dot(la[tid], lb[tid])

        q_scale = 1.0 / math.sqrt(HD)
        wqkv = jnp.concatenate(
            [merged(p['wq'], p['la_q'], p['lb_q']) * q_scale,
             merged(p['wk'], p['la_k'], p['lb_k']),
             merged(p['wv'], p['la_v'], p['lb_v'])], axis=1)          # (H, 3H)
        # MXU operands stored in bf16 (f32 masters kept in self.params).
        self.fused = {
            'wqkv': wqkv.astype(jnp.bfloat16),
            'wo': p['wo'].astype(jnp.bfloat16),
            'w1': p['w1'].astype(jnp.bfloat16),
            'w2': p['w2'].astype(jnp.bfloat16),
        }

    def forward(self, input_ids, attention_mask):
        p, fp = self.params, self.fused
        # torch builds adapter_mask = full((B,), task_id('retrieval.passage')).
        # It is uniform, so the corresponding LoRA adapter is already merged
        # into fp['wqkv'] (see __init__).
        x = jnp.take(p['tok_emb'], input_ids, axis=0) + p['pos_emb'][None]   # (B,S,H)
        x2 = x.reshape(BS, H)
        attn_bias = (1.0 - attention_mask.astype(jnp.float32))[:, None, :] * (-1e9)  # (B,1,S)

        args = (x2, attn_bias,
                fp['wqkv'], fp['wo'],
                fp['w1'], p['b1'], fp['w2'], p['b2'],
                p['ln1g'], p['ln1b'], p['ln2g'], p['ln2b'])

        flops = (2 * BS * H * 3 * H               # fused QKV
                 + 2 * (2 * B * NH * S * S * HD)  # scores + context
                 + 2 * BS * H * H                 # output proj
                 + 2 * 2 * BS * H * F)            # MLP
        transcendentals = B * NH * S * S + BS * F + 2 * BS
        bytes_accessed = sum(int(a.size) * a.dtype.itemsize for a in args) + BS * H * 4

        out2 = pl.pallas_call(
            encoder_layer_kernel,
            out_shape=jax.ShapeDtypeStruct((BS, H), jnp.float32),
            grid=(1,),
            in_specs=[_full_spec(a.shape) for a in args],
            out_specs=_full_spec((BS, H)),
            scratch_shapes=[pltpu.VMEM((BS, H), jnp.bfloat16)],
            compiler_params=pltpu.CompilerParams(
                dimension_semantics=("arbitrary",)),
            cost_estimate=pl.CostEstimate(
                flops=flops,
                transcendentals=transcendentals,
                bytes_accessed=bytes_accessed),
        )(*args)
        # returns last_hidden_state, as encoder.forward(...) does
        return out2.reshape(B, S, H)

    # pure-JAX reference for correctness checking (keeps the original
    # per-example adapter_mask/LoRA selection path, all f32).
    def reference_forward(self, input_ids, attention_mask):
        p = self.params
        task_id = ADAPTATION_MAP['retrieval.passage']
        adapter_mask = jnp.full((input_ids.shape[0],), task_id, dtype=jnp.int32)
        x = jnp.take(p['tok_emb'], input_ids, axis=0) + p['pos_emb'][None]
        mask = attention_mask.astype(jnp.float32)
        sel = lambda bank: jnp.take(bank, adapter_mask, axis=0)

        def lora_lin(w, a, b):
            base = jnp.einsum('bsh,hd->bsd', x, w)
            delta = jnp.einsum('bsr,brd->bsd', jnp.einsum('bsh,bhr->bsr', x, a), b)
            return base + LORA_SCALE * delta

        q = lora_lin(p['wq'], sel(p['la_q']), sel(p['lb_q'])).reshape(
            B, S, NH, HD).transpose(0, 2, 1, 3)
        k = lora_lin(p['wk'], sel(p['la_k']), sel(p['lb_k'])).reshape(
            B, S, NH, HD).transpose(0, 2, 1, 3)
        v = lora_lin(p['wv'], sel(p['la_v']), sel(p['lb_v'])).reshape(
            B, S, NH, HD).transpose(0, 2, 1, 3)
        s = jnp.einsum('bhqd,bhkd->bhqk', q, k) / math.sqrt(HD)
        s = s + (1.0 - mask)[:, None, None, :] * (-1e9)
        pr = jax.nn.softmax(s, axis=-1)
        ctx = jnp.einsum('bhqk,bhkd->bhqd', pr, v).transpose(0, 2, 1, 3).reshape(B, S, H)
        attn = jnp.einsum('bsh,hd->bsd', ctx, p['wo'])
        h1 = _layernorm(x + attn, p['ln1g'], p['ln1b'])
        m = jax.nn.gelu(jnp.einsum('bsh,hf->bsf', h1, p['w1']) + p['b1'],
                        approximate=True)
        m = jnp.einsum('bsf,fh->bsh', m, p['w2']) + p['b2']
        return _layernorm(h1 + m, p['ln2g'], p['ln2b'])


# TODO(synk): tokenization, HF checkpoint loading and the string-handling
# encode_queries/encode_corpus helpers have no Pallas equivalent; only the
# tensor forward pass (with adapter_mask / LoRA selection) is implemented.

if __name__ == "__main__":
    key = jax.random.PRNGKey(0)
    pkey, ikey = jax.random.split(key)
    model = JinaEmbeddingsV3WrapperPallas(pkey)

    input_ids = jax.random.randint(ikey, (B, S), 0, V, dtype=jnp.int32)
    attention_mask = jnp.array(
        [[1] * S, [1] * (S - 2) + [0, 0]], dtype=jnp.int32)

    out = model.forward(input_ids=input_ids, attention_mask=attention_mask)
    out = jax.block_until_ready(out)

    assert out.shape == (B, S, H) and out.dtype == jnp.float32
    assert bool(jnp.all(jnp.isfinite(out)))

    ref = model.reference_forward(input_ids, attention_mask)
    np.testing.assert_allclose(np.asarray(out), np.asarray(ref),
                               rtol=5e-2, atol=5e-2)
    print("KERNEL_OK")
</pallas_src>

<mosaic_0001>
module attributes {stable_mosaic.version = 11 : i64} {
  func.func @encoder_layer_kernel(%arg0: i32, %arg1: memref<16x128xf32, #tpu.memory_space<vmem>>, %arg2: memref<2x1x8xf32, #tpu.memory_space<vmem>>, %arg3: memref<128x384xbf16, #tpu.memory_space<vmem>>, %arg4: memref<128x128xbf16, #tpu.memory_space<vmem>>, %arg5: memref<128x256xbf16, #tpu.memory_space<vmem>>, %arg6: memref<1x256xf32, #tpu.memory_space<vmem>>, %arg7: memref<256x128xbf16, #tpu.memory_space<vmem>>, %arg8: memref<1x128xf32, #tpu.memory_space<vmem>>, %arg9: memref<1x128xf32, #tpu.memory_space<vmem>>, %arg10: memref<1x128xf32, #tpu.memory_space<vmem>>, %arg11: memref<1x128xf32, #tpu.memory_space<vmem>>, %arg12: memref<1x128xf32, #tpu.memory_space<vmem>>, %arg13: memref<16x128xf32, #tpu.memory_space<vmem>>, %arg14: memref<16x128xbf16, #tpu.memory_space<vmem>>) attributes {dimension_semantics = [#tpu.dimension_semantics<arbitrary>], iteration_bounds = array<i64: 1>, scalar_prefetch = 0 : i64, scratch_operands = 1 : i64, tpu.core_type = #tpu.core_type<tc>, window_params = [{pipeline_mode = #tpu.pipeline_mode<synchronous>, transform_indices = @transform_0, window_bounds = array<i64: 16, 128>}, {pipeline_mode = #tpu.pipeline_mode<synchronous>, transform_indices = @transform_1, window_bounds = array<i64: 2, 1, 8>}, {pipeline_mode = #tpu.pipeline_mode<synchronous>, transform_indices = @transform_2, window_bounds = array<i64: 128, 384>}, {pipeline_mode = #tpu.pipeline_mode<synchronous>, transform_indices = @transform_3, window_bounds = array<i64: 128, 128>}, {pipeline_mode = #tpu.pipeline_mode<synchronous>, transform_indices = @transform_4, window_bounds = array<i64: 128, 256>}, {pipeline_mode = #tpu.pipeline_mode<synchronous>, transform_indices = @transform_5, window_bounds = array<i64: 1, 256>}, {pipeline_mode = #tpu.pipeline_mode<synchronous>, transform_indices = @transform_6, window_bounds = array<i64: 256, 128>}, {pipeline_mode = #tpu.pipeline_mode<synchronous>, transform_indices = @transform_7, window_bounds = array<i64: 1, 128>}, {pipeline_mode = #tpu.pipeline_mode<synchronous>, transform_indices = @transform_8, window_bounds = array<i64: 1, 128>}, {pipeline_mode = #tpu.pipeline_mode<synchronous>, transform_indices = @transform_9, window_bounds = array<i64: 1, 128>}, {pipeline_mode = #tpu.pipeline_mode<synchronous>, transform_indices = @transform_10, window_bounds = array<i64: 1, 128>}, {pipeline_mode = #tpu.pipeline_mode<synchronous>, transform_indices = @transform_11, window_bounds = array<i64: 1, 128>}, {pipeline_mode = #tpu.pipeline_mode<synchronous>, transform_indices = @transform_12, window_bounds = array<i64: 16, 128>}]} {
    %c0 = arith.constant 0 : index
    %c0_0 = arith.constant 0 : index
    %0 = vector.load %arg1[%c0, %c0_0] : memref<16x128xf32, #tpu.memory_space<vmem>>, vector<16x128xf32>
    %1 = arith.truncf %0 : vector<16x128xf32> to vector<16x128xbf16>
    %c0_1 = arith.constant 0 : index
    %c0_2 = arith.constant 0 : index
    %2 = vector.load %arg3[%c0_1, %c0_2] : memref<128x384xbf16, #tpu.memory_space<vmem>>, vector<128x384xbf16>
    %cst = arith.constant dense<0.000000e+00> : vector<16x384xf32>
    %3 = tpu.matmul %1, %2, %cst {dimension_numbers = #tpu.dot_dimension_numbers<[1], [0], [0], [1], [0, 0, 1, 1], [], []>} : vector<16x128xbf16>, vector<128x384xbf16>, vector<16x384xf32> -> vector<16x384xf32>
    %4 = arith.truncf %3 : vector<16x384xf32> to vector<16x384xbf16>
    %c0_3 = arith.constant 0 : index
    %c0_4 = arith.constant 0 : index
    %c0_5 = arith.constant 0 : index
    %5 = vector.load %arg2[%c0_3, %c0_4, %c0_5] : memref<2x1x8xf32, #tpu.memory_space<vmem>>, vector<2x1x8xf32>
    %6 = vector.extract_strided_slice %4 {offsets = [0, 0], sizes = [16, 32], strides = [1, 1]} : vector<16x384xbf16> to vector<16x32xbf16>
    %7 = vector.shape_cast %6 : vector<16x32xbf16> to vector<2x8x32xbf16>
    %8 = vector.extract_strided_slice %4 {offsets = [0, 128], sizes = [16, 32], strides = [1, 1]} : vector<16x384xbf16> to vector<16x32xbf16>
    %9 = vector.shape_cast %8 : vector<16x32xbf16> to vector<2x8x32xbf16>
    %10 = vector.extract_strided_slice %4 {offsets = [0, 256], sizes = [16, 32], strides = [1, 1]} : vector<16x384xbf16> to vector<16x32xbf16>
    %11 = vector.shape_cast %10 : vector<16x32xbf16> to vector<2x8x32xbf16>
    "tpu.trace_start"() <{level = 10 : i32, message = "bqd,bkd->bqk"}> : () -> ()
    %cst_6 = arith.constant dense<0.000000e+00> : vector<2x8x8xf32>
    %12 = tpu.matmul %7, %9, %cst_6 {dimension_numbers = #tpu.dot_dimension_numbers<[2], [2], [1], [1], [0, 0, 0, 1, 1, 1], [0], [0]>} : vector<2x8x32xbf16>, vector<2x8x32xbf16>, vector<2x8x8xf32> -> vector<2x8x8xf32>
    "tpu.trace_stop"() : () -> ()
    %13 = vector.broadcast %5 : vector<2x1x8xf32> to vector<2x8x8xf32>
    %14 = arith.addf %12, %13 : vector<2x8x8xf32>
    %cst_7 = arith.constant dense<0xFF800000> : vector<2x8xf32>
    %15 = vector.multi_reduction <maximumf>, %14, %cst_7 [2] : vector<2x8x8xf32> to vector<2x8xf32>
    %16 = vector.shape_cast %15 : vector<2x8xf32> to vector<2x8x1xf32>
    %17 = vector.broadcast %16 : vector<2x8x1xf32> to vector<2x8x8xf32>
    %18 = arith.subf %14, %17 : vector<2x8x8xf32>
    %19 = math.exp %18 : vector<2x8x8xf32>
    %cst_8 = arith.constant dense<0.000000e+00> : vector<2x8xf32>
    %20 = vector.multi_reduction <add>, %19, %cst_8 [2] : vector<2x8x8xf32> to vector<2x8xf32>
    %21 = vector.shape_cast %20 : vector<2x8xf32> to vector<2x8x1xf32>
    %22 = tpu.reciprocal %21 {approx = true} : vector<2x8x1xf32> -> vector<2x8x1xf32>
    %23 = vector.broadcast %22 : vector<2x8x1xf32> to vector<2x8x8xf32>
    %24 = arith.mulf %19, %23 : vector<2x8x8xf32>
    %25 = arith.truncf %24 : vector<2x8x8xf32> to vector<2x8x8xbf16>
    "tpu.trace_start"() <{level = 10 : i32, message = "bqk,bkd->bqd"}> : () -> ()
    %cst_9 = arith.constant dense<0.000000e+00> : vector<2x8x32xf32>
    %26 = tpu.matmul %25, %11, %cst_9 {dimension_numbers = #tpu.dot_dimension_numbers<[2], [1], [1], [2], [0, 0, 0, 1, 1, 2], [0], [0]>} : vector<2x8x8xbf16>, vector<2x8x32xbf16>, vector<2x8x32xf32> -> vector<2x8x32xf32>
    "tpu.trace_stop"() : () -> ()
    %27 = vector.shape_cast %26 : vector<2x8x32xf32> to vector<16x32xf32>
    %28 = arith.truncf %27 : vector<16x32xf32> to vector<16x32xbf16>
    %c0_10 = arith.constant 0 : index
    %c0_11 = arith.constant 0 : index
    %29 = vector.load %arg14[%c0_10, %c0_11] : memref<16x128xbf16, #tpu.memory_space<vmem>>, vector<16x32xbf16>
    tpu.vector_store %arg14[%c0_10, %c0_11], %28 {strides = array<i32>} : memref<16x128xbf16, #tpu.memory_space<vmem>>, vector<16x32xbf16>,
    %30 = vector.extract_strided_slice %4 {offsets = [0, 32], sizes = [16, 32], strides = [1, 1]} : vector<16x384xbf16> to vector<16x32xbf16>
    %31 = vector.shape_cast %30 : vector<16x32xbf16> to vector<2x8x32xbf16>
    %32 = vector.extract_strided_slice %4 {offsets = [0, 160], sizes = [16, 32], strides = [1, 1]} : vector<16x384xbf16> to vector<16x32xbf16>
    %33 = vector.shape_cast %32 : vector<16x32xbf16> to vector<2x8x32xbf16>
    %34 = vector.extract_strided_slice %4 {offsets = [0, 288], sizes = [16, 32], strides = [1, 1]} : vector<16x384xbf16> to vector<16x32xbf16>
    %35 = vector.shape_cast %34 : vector<16x32xbf16> to vector<2x8x32xbf16>
    "tpu.trace_start"() <{level = 10 : i32, message = "bqd,bkd->bqk"}> : () -> ()
    %cst_12 = arith.constant dense<0.000000e+00> : vector<2x8x8xf32>
    %36 = tpu.matmul %31, %33, %cst_12 {dimension_numbers = #tpu.dot_dimension_numbers<[2], [2], [1], [1], [0, 0, 0, 1, 1, 1], [0], [0]>} : vector<2x8x32xbf16>, vector<2x8x32xbf16>, vector<2x8x8xf32> -> vector<2x8x8xf32>
    "tpu.trace_stop"() : () -> ()
    %37 = vector.broadcast %5 : vector<2x1x8xf32> to vector<2x8x8xf32>
    %38 = arith.addf %36, %37 : vector<2x8x8xf32>
    %cst_13 = arith.constant dense<0xFF800000> : vector<2x8xf32>
    %39 = vector.multi_reduction <maximumf>, %38, %cst_13 [2] : vector<2x8x8xf32> to vector<2x8xf32>
    %40 = vector.shape_cast %39 : vector<2x8xf32> to vector<2x8x1xf32>
    %41 = vector.broadcast %40 : vector<2x8x1xf32> to vector<2x8x8xf32>
    %42 = arith.subf %38, %41 : vector<2x8x8xf32>
    %43 = math.exp %42 : vector<2x8x8xf32>
    %cst_14 = arith.constant dense<0.000000e+00> : vector<2x8xf32>
    %44 = vector.multi_reduction <add>, %43, %cst_14 [2] : vector<2x8x8xf32> to vector<2x8xf32>
    %45 = vector.shape_cast %44 : vector<2x8xf32> to vector<2x8x1xf32>
    %46 = tpu.reciprocal %45 {approx = true} : vector<2x8x1xf32> -> vector<2x8x1xf32>
    %47 = vector.broadcast %46 : vector<2x8x1xf32> to vector<2x8x8xf32>
    %48 = arith.mulf %43, %47 : vector<2x8x8xf32>
    %49 = arith.truncf %48 : vector<2x8x8xf32> to vector<2x8x8xbf16>
    "tpu.trace_start"() <{level = 10 : i32, message = "bqk,bkd->bqd"}> : () -> ()
    %cst_15 = arith.constant dense<0.000000e+00> : vector<2x8x32xf32>
    %50 = tpu.matmul %49, %35, %cst_15 {dimension_numbers = #tpu.dot_dimension_numbers<[2], [1], [1], [2], [0, 0, 0, 1, 1, 2], [0], [0]>} : vector<2x8x8xbf16>, vector<2x8x32xbf16>, vector<2x8x32xf32> -> vector<2x8x32xf32>
    "tpu.trace_stop"() : () -> ()
    %51 = vector.shape_cast %50 : vector<2x8x32xf32> to vector<16x32xf32>
    %52 = arith.truncf %51 : vector<16x32xf32> to vector<16x32xbf16>
    %c0_16 = arith.constant 0 : index
    %c32 = arith.constant 32 : index
    %53 = vector.load %arg14[%c0_16, %c32] : memref<16x128xbf16, #tpu.memory_space<vmem>>, vector<16x32xbf16>
    tpu.vector_store %arg14[%c0_16, %c32], %52 {strides = array<i32>} : memref<16x128xbf16, #tpu.memory_space<vmem>>, vector<16x32xbf16>,
    %54 = vector.extract_strided_slice %4 {offsets = [0, 64], sizes = [16, 32], strides = [1, 1]} : vector<16x384xbf16> to vector<16x32xbf16>
    %55 = vector.shape_cast %54 : vector<16x32xbf16> to vector<2x8x32xbf16>
    %56 = vector.extract_strided_slice %4 {offsets = [0, 192], sizes = [16, 32], strides = [1, 1]} : vector<16x384xbf16> to vector<16x32xbf16>
    %57 = vector.shape_cast %56 : vector<16x32xbf16> to vector<2x8x32xbf16>
    %58 = vector.extract_strided_slice %4 {offsets = [0, 320], sizes = [16, 32], strides = [1, 1]} : vector<16x384xbf16> to vector<16x32xbf16>
    %59 = vector.shape_cast %58 : vector<16x32xbf16> to vector<2x8x32xbf16>
    "tpu.trace_start"() <{level = 10 : i32, message = "bqd,bkd->bqk"}> : () -> ()
    %cst_17 = arith.constant dense<0.000000e+00> : vector<2x8x8xf32>
    %60 = tpu.matmul %55, %57, %cst_17 {dimension_numbers = #tpu.dot_dimension_numbers<[2], [2], [1], [1], [0, 0, 0, 1, 1, 1], [0], [0]>} : vector<2x8x32xbf16>, vector<2x8x32xbf16>, vector<2x8x8xf32> -> vector<2x8x8xf32>
    "tpu.trace_stop"() : () -> ()
    %61 = vector.broadcast %5 : vector<2x1x8xf32> to vector<2x8x8xf32>
    %62 = arith.addf %60, %61 : vector<2x8x8xf32>
    %cst_18 = arith.constant dense<0xFF800000> : vector<2x8xf32>
    %63 = vector.multi_reduction <maximumf>, %62, %cst_18 [2] : vector<2x8x8xf32> to vector<2x8xf32>
    %64 = vector.shape_cast %63 : vector<2x8xf32> to vector<2x8x1xf32>
    %65 = vector.broadcast %64 : vector<2x8x1xf32> to vector<2x8x8xf32>
    %66 = arith.subf %62, %65 : vector<2x8x8xf32>
    %67 = math.exp %66 : vector<2x8x8xf32>
    %cst_19 = arith.constant dense<0.000000e+00> : vector<2x8xf32>
    %68 = vector.multi_reduction <add>, %67, %cst_19 [2] : vector<2x8x8xf32> to vector<2x8xf32>
    %69 = vector.shape_cast %68 : vector<2x8xf32> to vector<2x8x1xf32>
    %70 = tpu.reciprocal %69 {approx = true} : vector<2x8x1xf32> -> vector<2x8x1xf32>
    %71 = vector.broadcast %70 : vector<2x8x1xf32> to vector<2x8x8xf32>
    %72 = arith.mulf %67, %71 : vector<2x8x8xf32>
    %73 = arith.truncf %72 : vector<2x8x8xf32> to vector<2x8x8xbf16>
    "tpu.trace_start"() <{level = 10 : i32, message = "bqk,bkd->bqd"}> : () -> ()
    %cst_20 = arith.constant dense<0.000000e+00> : vector<2x8x32xf32>
    %74 = tpu.matmul %73, %59, %cst_20 {dimension_numbers = #tpu.dot_dimension_numbers<[2], [1], [1], [2], [0, 0, 0, 1, 1, 2], [0], [0]>} : vector<2x8x8xbf16>, vector<2x8x32xbf16>, vector<2x8x32xf32> -> vector<2x8x32xf32>
    "tpu.trace_stop"() : () -> ()
    %75 = vector.shape_cast %74 : vector<2x8x32xf32> to vector<16x32xf32>
    %76 = arith.truncf %75 : vector<16x32xf32> to vector<16x32xbf16>
    %c0_21 = arith.constant 0 : index
    %c64 = arith.constant 64 : index
    %77 = vector.load %arg14[%c0_21, %c64] : memref<16x128xbf16, #tpu.memory_space<vmem>>, vector<16x32xbf16>
    tpu.vector_store %arg14[%c0_21, %c64], %76 {strides = array<i32>} : memref<16x128xbf16, #tpu.memory_space<vmem>>, vector<16x32xbf16>,
    %78 = vector.extract_strided_slice %4 {offsets = [0, 96], sizes = [16, 32], strides = [1, 1]} : vector<16x384xbf16> to vector<16x32xbf16>
    %79 = vector.shape_cast %78 : vector<16x32xbf16> to vector<2x8x32xbf16>
    %80 = vector.extract_strided_slice %4 {offsets = [0, 224], sizes = [16, 32], strides = [1, 1]} : vector<16x384xbf16> to vector<16x32xbf16>
    %81 = vector.shape_cast %80 : vector<16x32xbf16> to vector<2x8x32xbf16>
    %82 = vector.extract_strided_slice %4 {offsets = [0, 352], sizes = [16, 32], strides = [1, 1]} : vector<16x384xbf16> to vector<16x32xbf16>
    %83 = vector.shape_cast %82 : vector<16x32xbf16> to vector<2x8x32xbf16>
    "tpu.trace_start"() <{level = 10 : i32, message = "bqd,bkd->bqk"}> : () -> ()
    %cst_22 = arith.constant dense<0.000000e+00> : vector<2x8x8xf32>
    %84 = tpu.matmul %79, %81, %cst_22 {dimension_numbers = #tpu.dot_dimension_numbers<[2], [2], [1], [1], [0, 0, 0, 1, 1, 1], [0], [0]>} : vector<2x8x32xbf16>, vector<2x8x32xbf16>, vector<2x8x8xf32> -> vector<2x8x8xf32>
    "tpu.trace_stop"() : () -> ()
    %85 = vector.broadcast %5 : vector<2x1x8xf32> to vector<2x8x8xf32>
    %86 = arith.addf %84, %85 : vector<2x8x8xf32>
    %cst_23 = arith.constant dense<0xFF800000> : vector<2x8xf32>
    %87 = vector.multi_reduction <maximumf>, %86, %cst_23 [2] : vector<2x8x8xf32> to vector<2x8xf32>
    %88 = vector.shape_cast %87 : vector<2x8xf32> to vector<2x8x1xf32>
    %89 = vector.broadcast %88 : vector<2x8x1xf32> to vector<2x8x8xf32>
    %90 = arith.subf %86, %89 : vector<2x8x8xf32>
    %91 = math.exp %90 : vector<2x8x8xf32>
    %cst_24 = arith.constant dense<0.000000e+00> : vector<2x8xf32>
    %92 = vector.multi_reduction <add>, %91, %cst_24 [2] : vector<2x8x8xf32> to vector<2x8xf32>
    %93 = vector.shape_cast %92 : vector<2x8xf32> to vector<2x8x1xf32>
    %94 = tpu.reciprocal %93 {approx = true} : vector<2x8x1xf32> -> vector<2x8x1xf32>
    %95 = vector.broadcast %94 : vector<2x8x1xf32> to vector<2x8x8xf32>
    %96 = arith.mulf %91, %95 : vector<2x8x8xf32>
    %97 = arith.truncf %96 : vector<2x8x8xf32> to vector<2x8x8xbf16>
    "tpu.trace_start"() <{level = 10 : i32, message = "bqk,bkd->bqd"}> : () -> ()
    %cst_25 = arith.constant dense<0.000000e+00> : vector<2x8x32xf32>
    %98 = tpu.matmul %97, %83, %cst_25 {dimension_numbers = #tpu.dot_dimension_numbers<[2], [1], [1], [2], [0, 0, 0, 1, 1, 2], [0], [0]>} : vector<2x8x8xbf16>, vector<2x8x32xbf16>, vector<2x8x32xf32> -> vector<2x8x32xf32>
    "tpu.trace_stop"() : () -> ()
    %99 = vector.shape_cast %98 : vector<2x8x32xf32> to vector<16x32xf32>
    %100 = arith.truncf %99 : vector<16x32xf32> to vector<16x32xbf16>
    %c0_26 = arith.constant 0 : index
    %c96 = arith.constant 96 : index
    %101 = vector.load %arg14[%c0_26, %c96] : memref<16x128xbf16, #tpu.memory_space<vmem>>, vector<16x32xbf16>
    tpu.vector_store %arg14[%c0_26, %c96], %100 {strides = array<i32>} : memref<16x128xbf16, #tpu.memory_space<vmem>>, vector<16x32xbf16>,
    %c0_27 = arith.constant 0 : index
    %c0_28 = arith.constant 0 : index
    %102 = vector.load %arg14[%c0_27, %c0_28] : memref<16x128xbf16, #tpu.memory_space<vmem>>, vector<16x128xbf16>
    %c0_29 = arith.constant 0 : index
    %c0_30 = arith.constant 0 : index
    %103 = vector.load %arg4[%c0_29, %c0_30] : memref<128x128xbf16, #tpu.memory_space<vmem>>, vector<128x128xbf16>
    %cst_31 = arith.constant dense<0.000000e+00> : vector<16x128xf32>
    %104 = tpu.matmul %102, %103, %cst_31 {dimension_numbers = #tpu.dot_dimension_numbers<[1], [0], [0], [1], [0, 0, 1, 1], [], []>} : vector<16x128xbf16>, vector<128x128xbf16>, vector<16x128xf32> -> vector<16x128xf32>
    %105 = arith.addf %0, %104 : vector<16x128xf32>
    %c0_32 = arith.constant 0 : index
    %c0_33 = arith.constant 0 : index
    %106 = vector.load %arg9[%c0_32, %c0_33] : memref<1x128xf32, #tpu.memory_space<vmem>>, vector<1x128xf32>
    %c0_34 = arith.constant 0 : index
    %c0_35 = arith.constant 0 : index
    %107 = vector.load %arg10[%c0_34, %c0_35] : memref<1x128xf32, #tpu.memory_space<vmem>>, vector<1x128xf32>
    %cst_36 = arith.constant dense<0.000000e+00> : vector<16xf32>
    %108 = vector.multi_reduction <add>, %105, %cst_36 [1] : vector<16x128xf32> to vector<16xf32>
    %109 = vector.shape_cast %108 : vector<16xf32> to vector<16x1xf32>
    %cst_37 = arith.constant 1.280000e+02 : f32
    %110 = vector.broadcast %cst_37 : f32 to vector<16x1xf32>
    %111 = arith.divf %109, %110 : vector<16x1xf32>
    %112 = vector.broadcast %111 : vector<16x1xf32> to vector<16x128xf32>
    %113 = arith.subf %105, %112 : vector<16x128xf32>
    %114 = arith.mulf %113, %113 : vector<16x128xf32>
    %cst_38 = arith.constant dense<0.000000e+00> : vector<16xf32>
    %115 = vector.multi_reduction <add>, %114, %cst_38 [1] : vector<16x128xf32> to vector<16xf32>
    %116 = vector.shape_cast %115 : vector<16xf32> to vector<16x1xf32>
    %cst_39 = arith.constant 1.280000e+02 : f32
    %117 = vector.broadcast %cst_39 : f32 to vector<16x1xf32>
    %118 = arith.divf %116, %117 : vector<16x1xf32>
    %119 = vector.broadcast %111 : vector<16x1xf32> to vector<16x128xf32>
    %120 = arith.subf %105, %119 : vector<16x128xf32>
    %cst_40 = arith.constant 9.99999974E-6 : f32
    %121 = vector.broadcast %cst_40 : f32 to vector<16x1xf32>
    %122 = arith.addf %118, %121 : vector<16x1xf32>
    %123 = math.rsqrt %122 : vector<16x1xf32>
    %124 = vector.broadcast %123 : vector<16x1xf32> to vector<16x128xf32>
    %125 = arith.mulf %120, %124 : vector<16x128xf32>
    %126 = vector.broadcast %106 : vector<1x128xf32> to vector<16x128xf32>
    %127 = arith.mulf %125, %126 : vector<16x128xf32>
    %128 = vector.broadcast %107 : vector<1x128xf32> to vector<16x128xf32>
    %129 = arith.addf %127, %128 : vector<16x128xf32>
    %130 = arith.truncf %129 : vector<16x128xf32> to vector<16x128xbf16>
    %c0_41 = arith.constant 0 : index
    %c0_42 = arith.constant 0 : index
    %131 = vector.load %arg5[%c0_41, %c0_42] : memref<128x256xbf16, #tpu.memory_space<vmem>>, vector<128x256xbf16>
    %cst_43 = arith.constant dense<0.000000e+00> : vector<16x256xf32>
    %132 = tpu.matmul %130, %131, %cst_43 {dimension_numbers = #tpu.dot_dimension_numbers<[1], [0], [0], [1], [0, 0, 1, 1], [], []>} : vector<16x128xbf16>, vector<128x256xbf16>, vector<16x256xf32> -> vector<16x256xf32>
    %c0_44 = arith.constant 0 : index
    %c0_45 = arith.constant 0 : index
    %133 = vector.load %arg6[%c0_44, %c0_45] : memref<1x256xf32, #tpu.memory_space<vmem>>, vector<1x256xf32>
    %134 = vector.broadcast %133 : vector<1x256xf32> to vector<16x256xf32>
    %135 = arith.addf %132, %134 : vector<16x256xf32>
    %136 = arith.mulf %135, %135 : vector<16x256xf32>
    %137 = arith.mulf %135, %136 : vector<16x256xf32>
    %cst_46 = arith.constant 4.471500e-02 : f32
    %138 = vector.broadcast %cst_46 : f32 to vector<16x256xf32>
    %139 = arith.mulf %138, %137 : vector<16x256xf32>
    %140 = arith.addf %135, %139 : vector<16x256xf32>
    %cst_47 = arith.constant 0.797884583 : f32
    %141 = vector.broadcast %cst_47 : f32 to vector<16x256xf32>
    %142 = arith.mulf %141, %140 : vector<16x256xf32>
    %143 = math.tanh %142 : vector<16x256xf32>
    %cst_48 = arith.constant 1.000000e+00 : f32
    %144 = vector.broadcast %cst_48 : f32 to vector<16x256xf32>
    %145 = arith.addf %144, %143 : vector<16x256xf32>
    %cst_49 = arith.constant 5.000000e-01 : f32
    %146 = vector.broadcast %cst_49 : f32 to vector<16x256xf32>
    %147 = arith.mulf %146, %145 : vector<16x256xf32>
    %148 = arith.mulf %135, %147 : vector<16x256xf32>
    %149 = arith.truncf %148 : vector<16x256xf32> to vector<16x256xbf16>
    %c0_50 = arith.constant 0 : index
    %c0_51 = arith.constant 0 : index
    %150 = vector.load %arg7[%c0_50, %c0_51] : memref<256x128xbf16, #tpu.memory_space<vmem>>, vector<256x128xbf16>
    %cst_52 = arith.constant dense<0.000000e+00> : vector<16x128xf32>
    %151 = tpu.matmul %149, %150, %cst_52 {dimension_numbers = #tpu.dot_dimension_numbers<[1], [0], [0], [1], [0, 0, 1, 1], [], []>} : vector<16x256xbf16>, vector<256x128xbf16>, vector<16x128xf32> -> vector<16x128xf32>
    %c0_53 = arith.constant 0 : index
    %c0_54 = arith.constant 0 : index
    %152 = vector.load %arg8[%c0_53, %c0_54] : memref<1x128xf32, #tpu.memory_space<vmem>>, vector<1x128xf32>
    %153 = vector.broadcast %152 : vector<1x128xf32> to vector<16x128xf32>
    %154 = arith.addf %151, %153 : vector<16x128xf32>
    %155 = arith.addf %129, %154 : vector<16x128xf32>
    %c0_55 = arith.constant 0 : index
    %c0_56 = arith.constant 0 : index
    %156 = vector.load %arg11[%c0_55, %c0_56] : memref<1x128xf32, #tpu.memory_space<vmem>>, vector<1x128xf32>
    %c0_57 = arith.constant 0 : index
    %c0_58 = arith.constant 0 : index
    %157 = vector.load %arg12[%c0_57, %c0_58] : memref<1x128xf32, #tpu.memory_space<vmem>>, vector<1x128xf32>
    %cst_59 = arith.constant dense<0.000000e+00> : vector<16xf32>
    %158 = vector.multi_reduction <add>, %155, %cst_59 [1] : vector<16x128xf32> to vector<16xf32>
    %159 = vector.shape_cast %158 : vector<16xf32> to vector<16x1xf32>
    %cst_60 = arith.constant 1.280000e+02 : f32
    %160 = vector.broadcast %cst_60 : f32 to vector<16x1xf32>
    %161 = arith.divf %159, %160 : vector<16x1xf32>
    %162 = vector.broadcast %161 : vector<16x1xf32> to vector<16x128xf32>
    %163 = arith.subf %155, %162 : vector<16x128xf32>
    %164 = arith.mulf %163, %163 : vector<16x128xf32>
    %cst_61 = arith.constant dense<0.000000e+00> : vector<16xf32>
    %165 = vector.multi_reduction <add>, %164, %cst_61 [1] : vector<16x128xf32> to vector<16xf32>
    %166 = vector.shape_cast %165 : vector<16xf32> to vector<16x1xf32>
    %cst_62 = arith.constant 1.280000e+02 : f32
    %167 = vector.broadcast %cst_62 : f32 to vector<16x1xf32>
    %168 = arith.divf %166, %167 : vector<16x1xf32>
    %169 = vector.broadcast %161 : vector<16x1xf32> to vector<16x128xf32>
    %170 = arith.subf %155, %169 : vector<16x128xf32>
    %cst_63 = arith.constant 9.99999974E-6 : f32
    %171 = vector.broadcast %cst_63 : f32 to vector<16x1xf32>
    %172 = arith.addf %168, %171 : vector<16x1xf32>
    %173 = math.rsqrt %172 : vector<16x1xf32>
    %174 = vector.broadcast %173 : vector<16x1xf32> to vector<16x128xf32>
    %175 = arith.mulf %170, %174 : vector<16x128xf32>
    %176 = vector.broadcast %156 : vector<1x128xf32> to vector<16x128xf32>
    %177 = arith.mulf %175, %176 : vector<16x128xf32>
    %178 = vector.broadcast %157 : vector<1x128xf32> to vector<16x128xf32>
    %179 = arith.addf %177, %178 : vector<16x128xf32>
    %c0_64 = arith.constant 0 : index
    %c0_65 = arith.constant 0 : index
    %180 = vector.load %arg13[%c0_64, %c0_65] : memref<16x128xf32, #tpu.memory_space<vmem>>, vector<16x128xf32>
    tpu.vector_store %arg13[%c0_64, %c0_65], %179 {strides = array<i32>} : memref<16x128xf32, #tpu.memory_space<vmem>>, vector<16x128xf32>,
    return
  }
  func.func @transform_0(%arg0: i32) -> (i32, i32) {
    %c0_i32 = arith.constant 0 : i32
    %c0_i32_0 = arith.constant 0 : i32
    %c0_i32_1 = arith.constant 0 : i32
    return %c0_i32, %c0_i32_0 : i32, i32
  }
  func.func @transform_1(%arg0: i32) -> (i32, i32, i32) {
    %c0_i32 = arith.constant 0 : i32
    %c0_i32_0 = arith.constant 0 : i32
    %c0_i32_1 = arith.constant 0 : i32
    %c0_i32_2 = arith.constant 0 : i32
    return %c0_i32, %c0_i32_0, %c0_i32_1 : i32, i32, i32
  }
  func.func @transform_2(%arg0: i32) -> (i32, i32) {
    %c0_i32 = arith.constant 0 : i32
    %c0_i32_0 = arith.constant 0 : i32
    %c0_i32_1 = arith.constant 0 : i32
    return %c0_i32, %c0_i32_0 : i32, i32
  }
  func.func @transform_3(%arg0: i32) -> (i32, i32) {
    %c0_i32 = arith.constant 0 : i32
    %c0_i32_0 = arith.constant 0 : i32
    %c0_i32_1 = arith.constant 0 : i32
    return %c0_i32, %c0_i32_0 : i32, i32
  }
  func.func @transform_4(%arg0: i32) -> (i32, i32) {
    %c0_i32 = arith.constant 0 : i32
    %c0_i32_0 = arith.constant 0 : i32
    %c0_i32_1 = arith.constant 0 : i32
    return %c0_i32, %c0_i32_0 : i32, i32
  }
  func.func @transform_5(%arg0: i32) -> (i32, i32) {
    %c0_i32 = arith.constant 0 : i32
    %c0_i32_0 = arith.constant 0 : i32
    %c0_i32_1 = arith.constant 0 : i32
    return %c0_i32, %c0_i32_0 : i32, i32
  }
  func.func @transform_6(%arg0: i32) -> (i32, i32) {
    %c0_i32 = arith.constant 0 : i32
    %c0_i32_0 = arith.constant 0 : i32
    %c0_i32_1 = arith.constant 0 : i32
    return %c0_i32, %c0_i32_0 : i32, i32
  }
  func.func @transform_7(%arg0: i32) -> (i32, i32) {
    %c0_i32 = arith.constant 0 : i32
    %c0_i32_0 = arith.constant 0 : i32
    %c0_i32_1 = arith.constant 0 : i32
    return %c0_i32, %c0_i32_0 : i32, i32
  }
  func.func @transform_8(%arg0: i32) -> (i32, i32) {
    %c0_i32 = arith.constant 0 : i32
    %c0_i32_0 = arith.constant 0 : i32
    %c0_i32_1 = arith.constant 0 : i32
    return %c0_i32, %c0_i32_0 : i32, i32
  }
  func.func @transform_9(%arg0: i32) -> (i32, i32) {
    %c0_i32 = arith.constant 0 : i32
    %c0_i32_0 = arith.constant 0 : i32
    %c0_i32_1 = arith.constant 0 : i32
    return %c0_i32, %c0_i32_0 : i32, i32
  }
  func.func @transform_10(%arg0: i32) -> (i32, i32) {
    %c0_i32 = arith.constant 0 : i32
    %c0_i32_0 = arith.constant 0 : i32
    %c0_i32_1 = arith.constant 0 : i32
    return %c0_i32, %c0_i32_0 : i32, i32
  }
  func.func @transform_11(%arg0: i32) -> (i32, i32) {
    %c0_i32 = arith.constant 0 : i32
    %c0_i32_0 = arith.constant 0 : i32
    %c0_i32_1 = arith.constant 0 : i32
    return %c0_i32, %c0_i32_0 : i32, i32
  }
  func.func @transform_12(%arg0: i32) -> (i32, i32) {
    %c0_i32 = arith.constant 0 : i32
    %c0_i32_0 = arith.constant 0 : i32
    %c0_i32_1 = arith.constant 0 : i32
    return %c0_i32, %c0_i32_0 : i32, i32
  }
}

</mosaic_0001>

<bundles_post_ra>
// kernel: tpu_custom_call.1
= control target key start
LH: loop header
LB: loop body
LE: loop exit
PB: predicated region body
PF: predicated region fallthrough
CT: control target
= control target key end

     0   :  { %17 = vsyncpa [#allocation4], 0  ;;  %s2897_s0 = inlined_call_operand.hbm [shape: f32[16,128], index: 0, kind: input, shape index: {}]   ;;  %s2898_s1 = inlined_call_operand.hbm [shape: f32[2,1,8], index: 1, kind: input, shape index: {}]   ;;  %s2899_s2 = inlined_call_operand.hbm [shape: bf16[128,384], index: 2, kind: input, shape index: {}]   ;;  %s2900_s3 = inlined_call_operand.hbm [shape: bf16[128,128], index: 3, kind: input, shape index: {}]   ;;  %s2901_s4 = inlined_call_operand.hbm [shape: bf16[128,256], index: 4, kind: input, shape index: {}]   ;;  %s2902_s5 = inlined_call_operand.vmem [shape: f32[1,256], index: 5, kind: input, shape index: {}]   ;;  %s2903_s6 = inlined_call_operand.hbm [shape: bf16[256,128], index: 6, kind: input, shape index: {}]   ;;  %s2904_s7 = inlined_call_operand.vmem [shape: f32[1,128], index: 7, kind: input, shape index: {}]   ;;  %s2905_s8 = inlined_call_operand.vmem [shape: f32[1,128], index: 8, kind: input, shape index: {}]   ;;  %s2906_s9 = inlined_call_operand.vmem [shape: f32[1,128], index: 9, kind: input, shape index: {}]   ;;  %s2907_s10 = inlined_call_operand.vmem [shape: f32[1,128], index: 10, kind: input, shape index: {}]   ;;  %s2908_s11 = inlined_call_operand.vmem [shape: f32[1,128], index: 11, kind: input, shape index: {}]   ;;  %s2909_s12 = inlined_call_operand.hbm [shape: f32[16,128], index: 12, kind: output, shape index: {}]  }
   0x1   :  { %18 = vsyncpa [#allocation7], 0 }
   0x2   :  { %19 = vsyncpa [#allocation10], 0 }
   0x3   :  { %20 = vsyncpa [#allocation13], 0 }
   0x4   :  { %21 = vsyncpa [#allocation5], 0  ;;  %s2540_s21 = smov [#allocation6]  }
   0x5   :  { %s39_s22 = sshll.u32 %s2540_s21, 4  ;;  %s40_s22 = int_to_ptr.vmem [resolvable:$true] %s39_s22 }
   0x6   :  { %s2398_s23 = scalar_lea.vmem %s40_s22, 32  ;;  %p2403_p1 = scmp.lt.s32.totalorder %s40_s22, %s40_s22 }
   0x7   :  { %p2399_p0 = scmp.ne.s32.totalorder %s40_s22, %s2398_s23  ;;  %p2404_p2 = scmp.lt.s32.totalorder %s2398_s23, %s2398_s23 }
   0x9   :  { %p2405_p3 = por %p2404_p2, %p2403_p1 }
   0xb   :  { %p2406_p4 = pnand %p2405_p3, %p2399_p0 }
   0xd   :  { %2409 = shalt.err (!%p2406_p4)
}
   0xe   :  { %s2541_s24 = smov 16   ;;  %s2542_s25 = smov 1  }
   0xf   :  { %45 = dma.hbm_to_vmem [thread:$0]  %s2898_s1, 32, %s40_s22, [#allocation7], %s2541_s24, %s2541_s24, %s2542_s25  }
  0x10   :  { %s2543_s28 = smov [#allocation9]  }
  0x11   :  { %s63_s29 = sshll.u32 %s2543_s28, 4  ;;  %s64_s29 = int_to_ptr.vmem [resolvable:$true] %s63_s29 }
  0x12   :  { %s2418_s30 = scalar_lea.vmem %s64_s29, 1024  ;;  %p2423_p6 = scmp.lt.s32.totalorder %s64_s29, %s64_s29 }
  0x13   :  { %p2419_p5 = scmp.ne.s32.totalorder %s64_s29, %s2418_s30  ;;  %p2424_p7 = scmp.lt.s32.totalorder %s2418_s30, %s2418_s30 }
  0x15   :  { %p2425_p8 = por %p2424_p7, %p2423_p6 }
  0x17   :  { %p2426_p9 = pnand %p2425_p8, %p2419_p5 }
  0x19   :  { %2429 = shalt.err (!%p2426_p9)
}
  0x1a   :  { %s2544_s13 = smov 64   ;;  %s2545_s14 = smov 4  }
  0x1b   :  { %69 = dma.hbm_to_vmem [thread:$0]  %s2900_s3, 1024, %s64_s29, [#allocation10], %s2544_s13, %s2544_s13, %s2545_s14  }
  0x1c   :  { %s2546_s1 = smov [#allocation3]  }
  0x1d   :  { %s27_s17 = sshll.u32 %s2546_s1, 4  ;;  %s28_s17 = int_to_ptr.vmem [resolvable:$true] %s27_s17 }
  0x1e   :  { %s2438_s18 = scalar_lea.vmem %s28_s17, 256  ;;  %p2443_p11 = scmp.lt.s32.totalorder %s28_s17, %s28_s17 }
  0x1f   :  { %p2439_p10 = scmp.ne.s32.totalorder %s28_s17, %s2438_s18  ;;  %p2444_p12 = scmp.lt.s32.totalorder %s2438_s18, %s2438_s18 }
  0x21   :  { %p2445_p13 = por %p2444_p12, %p2443_p11 }
  0x23   :  { %p2446_p0 = pnand %p2445_p13, %p2439_p10 }
  0x25   :  { %2449 = shalt.err (!%p2446_p0)
}
  0x26   :  { %s2547_s19 = smov 128   ;;  %s2548_s20 = smov 8  }
  0x27   :  { %33 = dma.hbm_to_vmem [thread:$0]  %s2897_s0, 256, %s28_s17, [#allocation4], %s2547_s19, %s2547_s19, %s2548_s20  }
  0x28   :  { %s2549_s3 = smov [#allocation8]  }
  0x29   :  { %s51_s23 = sshll.u32 %s2549_s3, 4  ;;  %s52_s23 = int_to_ptr.vmem [resolvable:$true] %s51_s23 }
  0x2a   :  { %s2458_s24 = scalar_lea.vmem %s52_s23, 3072  ;;  %p2463_p2 = scmp.lt.s32.totalorder %s52_s23, %s52_s23 }
  0x2b   :  { %p2459_p1 = scmp.ne.s32.totalorder %s52_s23, %s2458_s24  ;;  %p2464_p3 = scmp.lt.s32.totalorder %s2458_s24, %s2458_s24 }
  0x2d   :  { %p2465_p4 = por %p2464_p3, %p2463_p2 }
  0x2f   :  { %p2466_p5 = pnand %p2465_p4, %p2459_p1 }
  0x31   :  { %2469 = shalt.err (!%p2466_p5)
}
  0x32   :  { %s2550_s25 = smov 192   ;;  %s2551_s26 = smov 12  }
  0x33   :  { %57 = dma.hbm_to_vmem [thread:$0]  %s2899_s2, 3072, %s52_s23, [#allocation7], %s2550_s25, %s2550_s25, %s2551_s26  }
  0x34   :  { %s2552_s29 = smov [#allocation11]   ;;  %s2553_s15 = smov [#allocation12]  }
  0x35   :  { %s75_s30 = sshll.u32 %s2552_s29, 4  ;;  %s89_s0 = sshll.u32 %s2553_s15, 4  ;;  %s76_s30 = int_to_ptr.vmem [resolvable:$true] %s75_s30  ;;  %s90_s0 = int_to_ptr.vmem [resolvable:$true] %s89_s0 }
  0x36   :  { %s2478_s16 = scalar_lea.vmem %s76_s30, 2048  ;;  %p2483_p7 = scmp.lt.s32.totalorder %s76_s30, %s76_s30 }
  0x37   :  { %p2479_p6 = scmp.ne.s32.totalorder %s76_s30, %s2478_s16  ;;  %p2484_p8 = scmp.lt.s32.totalorder %s2478_s16, %s2478_s16 }
  0x39   :  { %p2485_p9 = por %p2484_p8, %p2483_p7 }
  0x3b   :  { %p2486_p10 = pnand %p2485_p9, %p2479_p6 }
  0x3d   :  { %2489 = shalt.err (!%p2486_p10)
}
  0x3e   :  { %81 = dma.hbm_to_vmem [thread:$0]  %s2901_s4, 2048, %s76_s30, [#allocation10], %s2547_s19, %s2547_s19, %s2548_s20  }
  0x3f   :  { %s2498_s2 = scalar_lea.vmem %s90_s0, 2048  ;;  %p2503_p12 = scmp.lt.s32.totalorder %s90_s0, %s90_s0 }
  0x40   :  { %p2499_p11 = scmp.ne.s32.totalorder %s90_s0, %s2498_s2  ;;  %p2504_p13 = scmp.lt.s32.totalorder %s2498_s2, %s2498_s2 }
  0x42   :  { %p2505_p0 = por %p2504_p13, %p2503_p12 }
  0x44   :  { %p2506_p1 = pnand %p2505_p0, %p2499_p11 }
  0x46   :  { %2509 = shalt.err (!%p2506_p1)
}
  0x47   :  { %95 = dma.hbm_to_vmem [thread:$0]  %s2903_s6, 2048, %s90_s0, [#allocation13], %s2544_s13, %s2544_s13, %s2545_s14  }
  0x48   :  { %2530 = dma.done.wait [#allocation4], 256  }
  0x49   :  { %2531 = vsyncadd [#allocation4], 4294967040 }
  0x4a   :  { %2532 = dma.done.wait [#allocation7], 3104  }
  0x4b   :  { %2533 = vsyncadd [#allocation7], 4294964192 }
  0x4c   :  { %2534 = dma.done.wait [#allocation10], 3072  }
  0x4d   :  { %2535 = vsyncadd [#allocation10], 4294964224 }
  0x4e   :  { %2536 = dma.done.wait [#allocation13], 2048  }
  0x4f   :  { %2537 = vsyncadd [#allocation13], 4294965248  ;;  %v2554_v0 = vmov 0   ;;  %v2555_v1 = vmov 0.0   ;;  %vm2556_vm0 = vmmov 0   ;;  %v2662_v23 = vld [vmem:[#allocation3] sm:$0xff] }
  0x50   :  { %320 = vmatprep.mubr.bf16.mxu0 %v2554_v0  ;;  %2105 = vmatprep.subr.bf16.mxu1 %v2555_v1  ;;  %v2261_v2 = vld [vmem:[#allocation8 + $0xac] ss:$12 sps:$4 sm:$0xff]   ;;  %v2263_v3 = vld [vmem:[#allocation8 + $0xa8] ss:$12 sps:$4 sm:$0xff]   ;;  %v2266_v5 = vld [vmem:[#allocation8 + $0x90] ss:$12 sps:$4 sm:$0xff]  }
  0x51   :  { %2121 = vmatprep.mubr.msk.bf16.mxu1 %vm2556_vm0, %v2555_v1  ;;  %288 = vmatprep.subr.bf16.mxu0 %v2261_v2  ;;  %v2264_v4 = vld [vmem:[#allocation8 + $0x94] ss:$12 sps:$4 sm:$0xff]   ;;  %v2267_v6 = vld [vmem:[#allocation8 + $0x7c] ss:$12 sps:$4 sm:$0xff]   ;;  %v2269_v7 = vld [vmem:[#allocation8 + $0x78] ss:$12 sps:$4 sm:$0xff]  }
  0x52   :  { %289 = vmatpush1.bf16.msra.mxu0 %v2263_v3  ;;  %v2270_v8 = vld [vmem:[#allocation8 + $0x64] ss:$12 sps:$4 sm:$0xff]   ;;  %v2272_v9 = vld [vmem:[#allocation8 + $0x60] ss:$12 sps:$4 sm:$0xff]   ;;  %v2275_v13 = vld [vmem:[#allocation8 + $0x48] ss:$12 sps:$4 sm:$0xff]  }
  0x53   :  { %290 = vmatprep.subr.bf16.mxu0 %v2264_v4  ;;  %v2273_v10 = vld [vmem:[#allocation8 + $0x4c] ss:$12 sps:$4 sm:$0xff]   ;;  %v2285_v11 = vld [vmem:[#allocation8 + $0xb0] ss:$12 sps:$4 sm:$0xff]   ;;  %v2276_v14 = vld [vmem:[#allocation8 + $0x34] ss:$12 sps:$4 sm:$0xff]  }
  0x54   :  { %2106 = vmatpush3.bf16.msra.mxu1 %v2285_v11  ;;  %v2286_v12 = vld [vmem:[#allocation8 + $0x98] ss:$12 sps:$4 sm:$0xff]   ;;  %v2278_v15 = vld [vmem:[#allocation8 + $0x30] ss:$12 sps:$4 sm:$0xff]   ;;  %v2287_v16 = vld [vmem:[#allocation8 + $0x80] ss:$12 sps:$4 sm:$0xff]  }
  0x55   :  { %2107 = vmatprep.subr.bf16.mxu1 %v2555_v1  ;;  %v2279_v17 = vld [vmem:[#allocation8 + $0x1c] ss:$12 sps:$4 sm:$0xff]   ;;  %v2281_v19 = vld [vmem:[#allocation8 + $0x18] ss:$12 sps:$4 sm:$0xff]   ;;  %v2284_v22 = vld [vmem:[#allocation8] ss:$12 sps:$4 sm:$0xff]  }
  0x56   :  { %291 = vmatpush1.bf16.msra.mxu0 %v2266_v5  ;;  %v2288_v18 = vld [vmem:[#allocation8 + $0x68] ss:$12 sps:$4 sm:$0xff]   ;;  %v2282_v20 = vld [vmem:[#allocation8 + $0x4] ss:$12 sps:$4 sm:$0xff]   ;;  %v2291_v27 = vld [vmem:[#allocation8 + $0x20] ss:$12 sps:$4 sm:$0xff]  }
  0x57   :  { %292 = vmatprep.subr.bf16.mxu0 %v2267_v6  ;;  %v2289_v21 = vld [vmem:[#allocation8 + $0x50] ss:$12 sps:$4 sm:$0xff]   ;;  %v2290_v25 = vld [vmem:[#allocation8 + $0x38] ss:$12 sps:$4 sm:$0xff]   ;;  %v2292_v28 = vld [vmem:[#allocation8 + $0x8] ss:$12 sps:$4 sm:$0xff]  }
  0x58   :  { %2108 = vmatpush3.bf16.msra.mxu1 %v2286_v12  ;;  %v2664_v24 = vld [vmem:[#allocation3 + $0x8] sm:$0xff]  ;;  %vm404_vm1 = vcmask 261120   ;;  %vm525_vm2 = vcmask 1043456   ;;  %v2705_v45 = vld [vmem:[#allocation6] ss:$0 sm:$0xff]  ;;  %vm497_vm3 = vcmask 64512  }
  0x59   :  { %2109 = vmatprep.subr.bf16.mxu1 %v2555_v1  ;;  %v127_v26 = vpack.c.bf16 %v2664_v24, %v2662_v23  ;;  %v2709_v52 = vld [vmem:[#allocation6 + $0x1] ss:$0 sm:$0xff]  ;;  %s2557_s4 = smov 96   ;;  %vm623_vm4 = vcmask 257024   ;;  %s2558_s6 = smov 32   ;;  %vm858_vm5 = vcmask 519424  }
  0x5a   :  { %293 = vmatpush1.bf16.msra.mxu0 %v2269_v7  ;;  %vm1093_vm6 = vcmask 781824   ;;  %vm1328_vm7 = vcmask 1044224   ;;  %s2559_s27 = smov [#allocation14]  }
  0x5b   :  { %294 = vmatprep.subr.bf16.mxu0 %v2270_v8  ;;  %s1902_s28 = sshll.u32 %s2559_s27, 4  ;;  %s1903_s28 = int_to_ptr.vmem [resolvable:$true] %s1902_s28 }
  0x5c   :  { %2110 = vmatpush3.bf16.msra.mxu1 %v2287_v16  ;;  %s2510_s29 = scalar_lea.vmem %s1903_s28, 256  ;;  %p2515_p3 = scmp.lt.s32.totalorder %s1903_s28, %s1903_s28 }
  0x5d   :  { %2111 = vmatprep.subr.bf16.mxu1 %v2555_v1  ;;  %p2511_p2 = scmp.ne.s32.totalorder %s1903_s28, %s2510_s29  ;;  %p2516_p4 = scmp.lt.s32.totalorder %s2510_s29, %s2510_s29 }
  0x5e   :  { %295 = vmatpush1.bf16.msra.mxu0 %v2272_v9 }
  0x5f   :  { %296 = vmatprep.subr.bf16.mxu0 %v2273_v10  ;;  %p2517_p5 = por %p2516_p4, %p2515_p3 }
  0x60   :  { %2112 = vmatpush3.bf16.msra.mxu1 %v2288_v18 }
  0x61   :  { %2113 = vmatprep.subr.bf16.mxu1 %v2555_v1  ;;  %p2518_p6 = pnand %p2517_p5, %p2511_p2 }
  0x62   :  { %297 = vmatpush1.bf16.msra.mxu0 %v2275_v13 }
  0x63   :  { %298 = vmatprep.subr.bf16.mxu0 %v2276_v14 }
  0x64   :  { %2114 = vmatpush3.bf16.msra.mxu1 %v2289_v21 }
  0x65   :  { %2115 = vmatprep.subr.bf16.mxu1 %v2555_v1 }
  0x66   :  { %299 = vmatpush1.bf16.msra.mxu0 %v2278_v15 }
  0x67   :  { %300 = vmatprep.subr.bf16.mxu0 %v2279_v17 }
  0x68   :  { %2116 = vmatpush3.bf16.msra.mxu1 %v2290_v25 }
  0x69   :  { %2117 = vmatprep.subr.bf16.mxu1 %v2555_v1 }
  0x6a   :  { %301 = vmatpush1.bf16.msra.mxu0 %v2281_v19 }
  0x6b   :  { %302 = vmatprep.subr.bf16.mxu0 %v2282_v20 }
  0x6c   :  { %2118 = vmatpush3.bf16.msra.mxu1 %v2291_v27 }
  0x6d   :  { %2119 = vmatprep.subr.bf16.mxu1 %v2555_v1 }
  0x6e   :  { %303 = vmatpush1.bf16.msra.mxu0 %v2284_v22 }
  0x6f   :  { %2149 = vmatprep.subr.bf16.mxu0 %v2555_v1 }
  0x70   :  { %2120 = vmatpush3.bf16.msra.mxu1 %v2292_v28 }
  0x71   :  { %321 = vmatmul.mubr.bf16.vlgmr.msra.gmra.mxu0 %v127_v26  ;;  %2125 = vmatprep.subr.bf16.mxu1 %v2555_v1 }
  0x72   :  { %2151 = vmatprep.mubr.msk.bf16.mxu0 %vm2556_vm0, %v2555_v1 }
  0x73   :  { %2122 = vmatmul.mubr.bf16.vlgmr.msra.gmra.mxu1 %v127_v26 }
  0x74   :  { %2127 = vmatprep.mubr.msk.bf16.mxu1 %vm2556_vm0, %v2555_v1 }
 0x131   :  { %v322_v29 = vpop.f32.mrf.mxu0 }
 0x132   :  { %v2685_v36 = vpack.c.bf16 %v322_v29, %v322_v29 }
 0x133   :  { %v324_v30 = vpop.f32.mrf.mxu0  ;;  %v365_v37 = vpop.f32.mrf.mxu1 }
 0x134   :  { %v2678_v31 = vpack.c.bf16 %v324_v30, %v324_v30  ;;  %v2693_v40 = vpack.c.bf16 %v365_v37, %v365_v37 }
 0x135   :  { %v326_v32 = vpop.f32.mrf.mxu0  ;;  %v2123_v39 = vpop.f32.mrf.mxu1 }
 0x136   :  { %v409_v33 = vsel %vm404_vm1, %v2678_v31, 0  ;;  %v2696_v43 = vpack.c.bf16 %v326_v32, %v326_v32  ;;  %v527_v44 = vsel %vm525_vm2, %v2693_v40, 0 }
 0x137   :  { %v328_v34 = vpop.f32.mrf.mxu0  ;;  %2126 = vmatpush3.bf16.xpose.msra.mxu1 %v409_v33  ;;  %v368_v41 = vpop.f32.mrf.mxu1 }
 0x138   :  { %2131 = vmatprep.subr.bf16.mxu1 %v2555_v1  ;;  %v2683_v35 = vpack.c.bf16 %v328_v34, %v328_v34  ;;  %v2725_v11 = vpack.c.bf16 %v368_v41, %v368_v41 }
 0x139   :  { %v2124_v42 = vpop.f32.mrf.mxu1 }
 0x13a   :  { %v455_v38 = vsel %vm404_vm1, %v2683_v35, 0  ;;  %v573_v14 = vsel %vm525_vm2, %v2725_v11, 0 }
 0x13e   :  { %2128 = vmatmul.mubr.msk.bf16.vlgmr.msra.gmra.mxu1 %vm404_vm1, %v2685_v36 }
 0x13f   :  { %2132 = vmatpush3.bf16.xpose.msra.mxu1 %v455_v38  ;;  %2133 = vmatprep.mubr.msk.bf16.mxu1 %vm2556_vm0, %v2555_v1 }
 0x140   :  { %2137 = vmatprep.subr.bf16.mxu1 %v2555_v1 }
 0x146   :  { %2134 = vmatmul.mubr.msk.bf16.vlgmr.msra.gmra.mxu1 %vm404_vm1, %v2696_v43 }
 0x147   :  { %2138 = vmatpush3.bf16.msra.mxu1 %v527_v44  ;;  %2139 = vmatprep.mubr.msk.bf16.mxu1 %vm2556_vm0, %v2555_v1 }
 0x148   :  { %2143 = vmatprep.subr.bf16.mxu1 %v2555_v1 }
 0x1fe   :  { %v445_v46 = vpop.f32.mrf.mxu1 }
 0x1ff   :  { %v446_v47 = vadd.f32 %v2705_v45, %v445_v46 }
 0x200   :  { %v2129_v48 = vpop.f32.mrf.mxu1 }
 0x201   :  { %v498_v49 = vsel %vm497_vm3, %v446_v47, -inf }
 0x202   :  { %499 = vmax.xlane.f32.xlu0 %v498_v49  ;;  %v448_v50 = vpop.f32.mrf.mxu1 }
 0x204   :  { %v2130_v51 = vpop.f32.mrf.mxu1 }
 0x206   :  { %v491_v53 = vpop.f32.mrf.mxu1 }
 0x207   :  { %v492_v54 = vadd.f32 %v2709_v52, %v491_v53 }
 0x208   :  { %v2135_v55 = vpop.f32.mrf.mxu1 }
 0x209   :  { %v501_v56 = vsel %vm497_vm3, %v492_v54, -inf }
 0x20a   :  { %502 = vmax.xlane.f32.xlu0 %v501_v56  ;;  %v494_v57 = vpop.f32.mrf.mxu1 }
 0x20c   :  { %v2136_v58 = vpop.f32.mrf.mxu1 }
 0x220   :  { %628 = vrot.lane.b32.xlu0 %v2678_v31, %s2557_s4 }
 0x28b   :  { %v500_v59 = vpop.xlane.xlu0 %499 }
 0x28c   :  { %v504_v60 = vsub.f32 %v446_v47, %v500_v59 }
 0x28e   :  { %v506_v61 = vmul.f32 1.442695, %v504_v60 }
 0x290   :  { %2342 = vpow2.f32 %v506_v61 }
 0x293   :  { %v503_v62 = vpop.xlane.xlu0 %502 }
 0x294   :  { %v505_v5 = vsub.f32 %v492_v54, %v503_v62 }
 0x296   :  { %v508_v6 = vmul.f32 1.442695, %v505_v5 }
 0x297   :  { %v629_v63 = vpop.permute.xlu0 %628 }
 0x298   :  { %v634_v2 = vsel %vm404_vm1, %v629_v63, 0  ;;  %2344 = vpow2.f32 %v508_v6 }
 0x299   :  { %2150 = vmatpush3.bf16.xpose.msra.mxu0 %v634_v2 }
 0x29a   :  { %2161 = vmatprep.subr.bf16.mxu0 %v2555_v1 }
 0x29d   :  { %v2343_v3 = vpop.eup %2342 }
 0x29e   :  { %v510_v4 = vsel %vm497_vm3, %v2343_v3, 0.0 }
 0x29f   :  { %511 = vadd.xlane.f32.xlu1 %v510_v4 }
 0x2a5   :  { %v2345_v7 = vpop.eup %2344 }
 0x2a6   :  { %v513_v8 = vsel %vm497_vm3, %v2345_v7, 0.0 }
 0x2b0   :  { %678 = vrot.lane.b32.xlu1 %v2683_v35, %s2557_s4 }
 0x2d4   :  { %514 = vadd.xlane.f32.xlu1 %v513_v8 }
 0x2e5   :  { %626 = vrot.lane.b32.xlu1 %v2685_v36, %s2557_s4 }
 0x2e9   :  { %676 = vrot.lane.b32.xlu1 %v2696_v43, %s2557_s4 }
 0x328   :  { %v512_v9 = vpop.xlane.xlu1 %511 }
 0x329   :  { %2346 = vrcp.f32 %v512_v9 }
 0x32c   :  { %v679_v15 = vpop.permute.xlu1 %678 }
 0x32d   :  { %v684_v21 = vsel %vm404_vm1, %v679_v15, 0 }
 0x336   :  { %v2347_v10 = vpop.eup %2346 }
 0x337   :  { %v518_v12 = vmul.f32 %v2347_v10, %v2343_v3 }
 0x339   :  { %v520_v13 = vpack.c.bf16 %v518_v12, %v518_v12 }
 0x33b   :  { %2140 = vmatmul.mubr.msk.bf16.vlgmr.msra.gmra.mxu1 %vm497_vm3, %v520_v13 }
 0x33c   :  { %2144 = vmatpush3.bf16.msra.mxu1 %v573_v14  ;;  %2145 = vmatprep.mubr.msk.bf16.mxu1 %vm2556_vm0, %v2555_v1 }
 0x33d   :  { %2155 = vmatprep.subr.bf16.mxu1 %v2555_v1 }
 0x35d   :  { %v515_v16 = vpop.xlane.xlu1 %514 }
 0x35e   :  { %2348 = vrcp.f32 %v515_v16 }
 0x361   :  { %v627_v17 = vpop.permute.xlu1 %626 }
 0x362   :  { %2152 = vmatmul.mubr.msk.bf16.vlgmr.msra.gmra.mxu0 %vm404_vm1, %v627_v17 }
 0x363   :  { %2163 = vmatprep.mubr.msk.bf16.mxu0 %vm2556_vm0, %v2555_v1 }
 0x365   :  { %v677_v22 = vpop.permute.xlu1 %676 }
 0x36b   :  { %v2349_v18 = vpop.eup %2348 }
 0x36c   :  { %v519_v19 = vmul.f32 %v2349_v18, %v2345_v7 }
 0x36e   :  { %v521_v20 = vpack.c.bf16 %v519_v19, %v519_v19 }
 0x370   :  { %2146 = vmatmul.mubr.msk.bf16.vlgmr.msra.gmra.mxu1 %vm497_vm3, %v521_v20 }
 0x371   :  { %2156 = vmatpush3.bf16.xpose.msra.mxu1 %v684_v21  ;;  %2157 = vmatprep.mubr.msk.bf16.mxu1 %vm2556_vm0, %v2555_v1 }
 0x372   :  { %2167 = vmatprep.subr.bf16.mxu1 %v2555_v1 }
 0x378   :  { %2158 = vmatmul.mubr.msk.bf16.vlgmr.msra.gmra.mxu1 %vm404_vm1, %v677_v22 }
 0x379   :  { %2169 = vmatprep.mubr.msk.bf16.mxu1 %vm2556_vm0, %v2555_v1 }
 0x3fb   :  { %v563_v25 = vpop.f32.mrf.mxu1 }
 0x3fc   :  { %v2025_v26 = vpack.c.bf16 %v563_v25, %v563_v25 }
 0x3fd   :  { %v2141_v27 = vpop.f32.mrf.mxu1 }
 0x3fe   :  { %624 = vst.msk [vmem:[#allocation2] sm:$0xf] %vm623_vm4, %v2025_v26 }
 0x3ff   :  { %v566_v28 = vpop.f32.mrf.mxu1 }
 0x401   :  { %v2142_v29 = vpop.f32.mrf.mxu1 }
 0x422   :  { %v670_v30 = vpop.f32.mrf.mxu0 }
 0x423   :  { %v671_v32 = vadd.f32 %v2705_v45, %v670_v30 }
 0x424   :  { %v2153_v33 = vpop.f32.mrf.mxu0 }
 0x425   :  { %v726_v34 = vsel %vm497_vm3, %v671_v32, -inf }
 0x426   :  { %727 = vmax.xlane.f32.xlu0 %v726_v34  ;;  %v673_v37 = vpop.f32.mrf.mxu0 }
 0x428   :  { %v2154_v38 = vpop.f32.mrf.mxu0 }
 0x430   :  { %v609_v39 = vpop.f32.mrf.mxu1 }
 0x431   :  { %v2026_v41 = vpack.c.bf16 %v609_v39, %v609_v39 }
 0x432   :  { %v2147_v42 = vpop.f32.mrf.mxu1 }
 0x433   :  { %625 = vst.msk [vmem:[#allocation2 + $0x4] sm:$0xf] %vm623_vm4, %v2026_v41 }
 0x434   :  { %v612_v44 = vpop.f32.mrf.mxu1 }
 0x436   :  { %v2148_v46 = vpop.f32.mrf.mxu1 }
 0x438   :  { %v720_v47 = vpop.f32.mrf.mxu1 }
 0x439   :  { %v721_v48 = vadd.f32 %v2709_v52, %v720_v47 }
 0x43a   :  { %v2159_v49 = vpop.f32.mrf.mxu1 }
 0x43b   :  { %v729_v50 = vsel %vm497_vm3, %v721_v48, -inf }
 0x43c   :  { %730 = vmax.xlane.f32.xlu1 %v729_v50  ;;  %v723_v51 = vpop.f32.mrf.mxu1 }
 0x43e   :  { %v2160_v53 = vpop.f32.mrf.mxu1 }
 0x44d   :  { %798 = vrot.lane.b32.xlu1 %v2725_v11, %s2557_s4 }
 0x451   :  { %863 = vrot.lane.b32.xlu1 %v2678_v31, %s2544_s13 }
 0x455   :  { %913 = vrot.lane.b32.xlu1 %v2683_v35, %s2544_s13 }
 0x459   :  { %911 = vrot.lane.b32.xlu1 %v2696_v43, %s2544_s13 }
 0x4af   :  { %v728_v54 = vpop.xlane.xlu0 %727 }
 0x4b0   :  { %v732_v55 = vsub.f32 %v671_v32, %v728_v54 }
 0x4b2   :  { %v734_v56 = vmul.f32 1.442695, %v732_v55 }
 0x4b4   :  { %2350 = vpow2.f32 %v734_v56 }
 0x4c1   :  { %v2351_v57 = vpop.eup %2350 }
 0x4c2   :  { %v738_v58 = vsel %vm497_vm3, %v2351_v57, 0.0 }
 0x4c3   :  { %739 = vadd.xlane.f32.xlu0 %v738_v58 }
 0x4c5   :  { %v731_v59 = vpop.xlane.xlu1 %730 }
 0x4c6   :  { %v733_v60 = vsub.f32 %v721_v48, %v731_v59 }
 0x4c8   :  { %v736_v61 = vmul.f32 1.442695, %v733_v60 }
 0x4c9   :  { %v799_v62 = vpop.permute.xlu1 %798 }
 0x4ca   :  { %2352 = vpow2.f32 %v736_v61  ;;  %v804_v63 = vsel %vm525_vm2, %v799_v62, 0 }
 0x4cb   :  { %2168 = vmatpush3.bf16.msra.mxu1 %v804_v63 }
 0x4cc   :  { %2179 = vmatprep.subr.bf16.mxu1 %v2555_v1 }
 0x4cd   :  { %v864_v10 = vpop.permute.xlu1 %863 }
 0x4ce   :  { %v869_v13 = vsel %vm404_vm1, %v864_v10, 0 }
 0x4d1   :  { %v914_v16 = vpop.permute.xlu1 %913 }
 0x4d2   :  { %v919_v19 = vsel %vm404_vm1, %v914_v16, 0 }
 0x4d5   :  { %v912_v20 = vpop.permute.xlu1 %911 }
 0x4d7   :  { %v2353_v2 = vpop.eup %2352 }
 0x4d8   :  { %v741_v3 = vsel %vm497_vm3, %v2353_v2, 0.0 }
 0x4d9   :  { %742 = vadd.xlane.f32.xlu0 %v741_v3 }
 0x4ef   :  { %750 = vrot.lane.b32.xlu0 %v2693_v40, %s2557_s4 }
 0x4f3   :  { %861 = vrot.lane.b32.xlu0 %v2685_v36, %s2544_s13 }
 0x54c   :  { %v740_v4 = vpop.xlane.xlu0 %739 }
 0x54d   :  { %2354 = vrcp.f32 %v740_v4 }
 0x55a   :  { %v2355_v5 = vpop.eup %2354 }
 0x55b   :  { %v746_v7 = vmul.f32 %v2355_v5, %v2351_v57 }
 0x55d   :  { %v748_v12 = vpack.c.bf16 %v746_v7, %v746_v7 }
 0x562   :  { %v743_v6 = vpop.xlane.xlu0 %742 }
 0x563   :  { %2356 = vrcp.f32 %v743_v6 }
 0x566   :  { %v751_v8 = vpop.permute.xlu0 %750 }
 0x567   :  { %v756_v9 = vsel %vm525_vm2, %v751_v8, 0 }
 0x568   :  { %2162 = vmatpush3.bf16.msra.mxu0 %v756_v9 }
 0x569   :  { %2173 = vmatprep.subr.bf16.mxu0 %v2555_v1 }
 0x56a   :  { %v862_v17 = vpop.permute.xlu0 %861 }
 0x56b   :  { %2164 = vmatmul.mubr.msk.bf16.vlgmr.msra.gmra.mxu0 %vm497_vm3, %v748_v12 }
 0x56c   :  { %2174 = vmatpush3.bf16.xpose.msra.mxu0 %v869_v13  ;;  %2175 = vmatprep.mubr.msk.bf16.mxu0 %vm2556_vm0, %v2555_v1 }
 0x56d   :  { %2185 = vmatprep.subr.bf16.mxu0 %v2555_v1 }
 0x570   :  { %v2357_v14 = vpop.eup %2356 }
 0x571   :  { %v747_v15 = vmul.f32 %v2357_v14, %v2353_v2 }
 0x573   :  { %2176 = vmatmul.mubr.msk.bf16.vlgmr.msra.gmra.mxu0 %vm404_vm1, %v862_v17  ;;  %v749_v18 = vpack.c.bf16 %v747_v15, %v747_v15 }
 0x574   :  { %2187 = vmatprep.mubr.msk.bf16.mxu0 %vm2556_vm0, %v2555_v1 }
 0x575   :  { %2170 = vmatmul.mubr.msk.bf16.vlgmr.msra.gmra.mxu1 %vm497_vm3, %v749_v18 }
 0x576   :  { %2180 = vmatpush3.bf16.xpose.msra.mxu1 %v919_v19  ;;  %2181 = vmatprep.mubr.msk.bf16.mxu1 %vm2556_vm0, %v2555_v1 }
 0x577   :  { %2191 = vmatprep.subr.bf16.mxu1 %v2555_v1 }
 0x57d   :  { %2182 = vmatmul.mubr.msk.bf16.vlgmr.msra.gmra.mxu1 %vm404_vm1, %v912_v20 }
 0x57e   :  { %2193 = vmatprep.mubr.msk.bf16.mxu1 %vm2556_vm0, %v2555_v1 }
 0x62b   :  { %v2784_v21 = vpop.f32.mrf.mxu0 }
 0x62d   :  { %v2165_v22 = vpop.f32.mrf.mxu0 }
 0x62f   :  { %v795_v25 = vpop.f32.mrf.mxu0 }
 0x631   :  { %v2166_v26 = vpop.f32.mrf.mxu0 }
 0x633   :  { %v905_v27 = vpop.f32.mrf.mxu0 }
 0x634   :  { %v906_v28 = vadd.f32 %v2705_v45, %v905_v27 }
 0x635   :  { %v2787_v29 = vpop.f32.mrf.mxu1  ;;  %v2177_v30 = vpop.f32.mrf.mxu0 }
 0x636   :  { %v961_v32 = vsel %vm497_vm3, %v906_v28, -inf }
 0x637   :  { %962 = vmax.xlane.f32.xlu0 %v961_v32  ;;  %v2171_v33 = vpop.f32.mrf.mxu1  ;;  %v908_v34 = vpop.f32.mrf.mxu0 }
 0x639   :  { %v843_v37 = vpop.f32.mrf.mxu1  ;;  %v2178_v38 = vpop.f32.mrf.mxu0 }
 0x63b   :  { %v2172_v39 = vpop.f32.mrf.mxu1 }
 0x63d   :  { %v955_v41 = vpop.f32.mrf.mxu1 }
 0x63e   :  { %v956_v42 = vadd.f32 %v2709_v52, %v955_v41  ;;  %v2028_v41 = vpack.c.bf16 %v2787_v29, %v2787_v29 }
 0x63f   :  { %v2183_v44 = vpop.f32.mrf.mxu1 }
 0x640   :  { %v964_v46 = vsel %vm497_vm3, %v956_v42, -inf }
 0x641   :  { %965 = vmax.xlane.f32.xlu1 %v964_v46  ;;  %v958_v47 = vpop.f32.mrf.mxu1 }
 0x643   :  { %v2184_v48 = vpop.f32.mrf.mxu1 }
 0x652   :  { %1033 = vrot.lane.b32.xlu1 %v2725_v11, %s2544_s13 }
 0x656   :  { %1098 = vrot.lane.b32.xlu1 %v2678_v31, %s2558_s6 }
 0x65a   :  { %1148 = vrot.lane.b32.xlu1 %v2683_v35, %s2558_s6 }
 0x65e   :  { %1146 = vrot.lane.b32.xlu1 %v2696_v43, %s2558_s6 }
 0x6c0   :  { %v963_v49 = vpop.xlane.xlu0 %962 }
 0x6c1   :  { %v967_v50 = vsub.f32 %v906_v28, %v963_v49 }
 0x6c3   :  { %v969_v51 = vmul.f32 1.442695, %v967_v50 }
 0x6c5   :  { %2358 = vpow2.f32 %v969_v51 }
 0x6ca   :  { %v966_v53 = vpop.xlane.xlu1 %965 }
 0x6cb   :  { %v968_v54 = vsub.f32 %v956_v42, %v966_v53 }
 0x6cd   :  { %v971_v55 = vmul.f32 1.442695, %v968_v54 }
 0x6ce   :  { %v1034_v56 = vpop.permute.xlu1 %1033 }
 0x6cf   :  { %2360 = vpow2.f32 %v971_v55  ;;  %v1039_v57 = vsel %vm525_vm2, %v1034_v56, 0 }
 0x6d0   :  { %2192 = vmatpush3.bf16.msra.mxu1 %v1039_v57 }
 0x6d1   :  { %2203 = vmatprep.subr.bf16.mxu1 %v2555_v1 }
 0x6d2   :  { %v2359_v31 = vpop.eup %2358  ;;  %v1099_v3 = vpop.permute.xlu1 %1098 }
 0x6d3   :  { %v973_v35 = vsel %vm497_vm3, %v2359_v31, 0.0  ;;  %v1104_v5 = vsel %vm404_vm1, %v1099_v3, 0  ;;  %v2293_v3 = vld [vmem:[#allocation9 + $0x38] sm:$0xff]  }
 0x6d4   :  { %974 = vadd.xlane.f32.xlu0 %v973_v35 }
 0x6d6   :  { %v1149_v7 = vpop.permute.xlu1 %1148 }
 0x6d7   :  { %v1154_v10 = vsel %vm404_vm1, %v1149_v7, 0  ;;  %v2298_v7 = vld [vmem:[#allocation9 + $0x10] sm:$0xff]  }
 0x6da   :  { %v1147_v12 = vpop.permute.xlu1 %1146 }
 0x6dc   :  { %v2361_v58 = vpop.eup %2360 }
 0x6dd   :  { %v976_v43 = vsel %vm497_vm3, %v2361_v58, 0.0 }
 0x6de   :  { %977 = vadd.xlane.f32.xlu0 %v976_v43 }
 0x6f4   :  { %985 = vrot.lane.b32.xlu0 %v2693_v40, %s2544_s13 }
 0x6f8   :  { %1096 = vrot.lane.b32.xlu0 %v2685_v36, %s2558_s6 }
 0x75d   :  { %v975_v59 = vpop.xlane.xlu0 %974 }
 0x75e   :  { %2362 = vrcp.f32 %v975_v59 }
 0x767   :  { %v978_v60 = vpop.xlane.xlu0 %977 }
 0x768   :  { %2364 = vrcp.f32 %v978_v60 }
 0x76b   :  { %v2363_v61 = vpop.eup %2362  ;;  %v986_v62 = vpop.permute.xlu0 %985 }
 0x76c   :  { %v991_v63 = vsel %vm525_vm2, %v986_v62, 0  ;;  %v981_v2 = vmul.f32 %v2363_v61, %v2359_v31 }
 0x76d   :  { %2186 = vmatpush3.bf16.msra.mxu0 %v991_v63 }
 0x76e   :  { %v983_v4 = vpack.c.bf16 %v981_v2, %v981_v2  ;;  %2197 = vmatprep.subr.bf16.mxu0 %v2555_v1 }
 0x76f   :  { %v1097_v8 = vpop.permute.xlu0 %1096 }
 0x770   :  { %2188 = vmatmul.mubr.msk.bf16.vlgmr.msra.gmra.mxu0 %vm497_vm3, %v983_v4  ;;  %v2294_v4 = vld [vmem:[#allocation9 + $0x30] sm:$0xff]  }
 0x771   :  { %2198 = vmatpush3.bf16.xpose.msra.mxu0 %v1104_v5  ;;  %2199 = vmatprep.mubr.msk.bf16.mxu0 %vm2556_vm0, %v2555_v1  ;;  %v2295_v5 = vld [vmem:[#allocation9 + $0x28] sm:$0xff]  }
 0x772   :  { %2209 = vmatprep.subr.bf16.mxu0 %v2555_v1 }
 0x775   :  { %v2365_v36 = vpop.eup %2364 }
 0x776   :  { %v982_v6 = vmul.f32 %v2365_v36, %v2361_v58  ;;  %v2296_v36 = vld [vmem:[#allocation9 + $0x20] sm:$0xff]  }
 0x778   :  { %2200 = vmatmul.mubr.msk.bf16.vlgmr.msra.gmra.mxu0 %vm404_vm1, %v1097_v8  ;;  %v984_v9 = vpack.c.bf16 %v982_v6, %v982_v6  ;;  %v2297_v6 = vld [vmem:[#allocation9 + $0x18] sm:$0xff]   ;;  %v2299_v8 = vld [vmem:[#allocation9 + $0x8] sm:$0xff]  }
 0x779   :  { %2211 = vmatprep.mubr.msk.bf16.mxu0 %vm2556_vm0, %v2555_v1 }
 0x77a   :  { %2194 = vmatmul.mubr.msk.bf16.vlgmr.msra.gmra.mxu1 %vm497_vm3, %v984_v9 }
 0x77b   :  { %2204 = vmatpush3.bf16.xpose.msra.mxu1 %v1154_v10  ;;  %2205 = vmatprep.mubr.msk.bf16.mxu1 %vm2556_vm0, %v2555_v1 }
 0x77c   :  { %2215 = vmatprep.subr.bf16.mxu1 %v2555_v1 }
 0x782   :  { %2206 = vmatmul.mubr.msk.bf16.vlgmr.msra.gmra.mxu1 %vm404_vm1, %v1147_v12  ;;  %v2300_v12 = vld [vmem:[#allocation9] sm:$0xff]  }
 0x783   :  { %2217 = vmatprep.mubr.msk.bf16.mxu1 %vm2556_vm0, %v2555_v1 }
 0x830   :  { %v1027_v13 = vpop.f32.mrf.mxu0 }
 0x831   :  { %v2029_v57 = vpack.c.bf16 %v1027_v13, %v1027_v13 }
 0x832   :  { %v2189_v14 = vpop.f32.mrf.mxu0 }
 0x834   :  { %v1030_v15 = vpop.f32.mrf.mxu0 }
 0x836   :  { %v2190_v16 = vpop.f32.mrf.mxu0 }
 0x838   :  { %v1140_v17 = vpop.f32.mrf.mxu0 }
 0x839   :  { %v1141_v18 = vadd.f32 %v2705_v45, %v1140_v17  ;;  %v2027_v45 = vpack.c.bf16 %v2784_v21, %v2784_v21 }
 0x83a   :  { %v1075_v19 = vpop.f32.mrf.mxu1  ;;  %v2201_v20 = vpop.f32.mrf.mxu0 }
 0x83b   :  { %v1196_v22 = vsel %vm497_vm3, %v1141_v18, -inf }
 0x83c   :  { %1197 = vmax.xlane.f32.xlu0 %v1196_v22  ;;  %v2195_v25 = vpop.f32.mrf.mxu1  ;;  %v1143_v26 = vpop.f32.mrf.mxu0 }
 0x83e   :  { %v1078_v27 = vpop.f32.mrf.mxu1  ;;  %v2202_v28 = vpop.f32.mrf.mxu0 }
 0x840   :  { %v2196_v30 = vpop.f32.mrf.mxu1 }
 0x842   :  { %v1190_v32 = vpop.f32.mrf.mxu1 }
 0x843   :  { %v1191_v33 = vadd.f32 %v2709_v52, %v1190_v32  ;;  %v2030_v52 = vpack.c.bf16 %v1075_v19, %v1075_v19 }
 0x844   :  { %v2207_v34 = vpop.f32.mrf.mxu1 }
 0x845   :  { %v1199_v37 = vsel %vm497_vm3, %v1191_v33, -inf  ;;  %v2304_v34 = vld [vmem:[#allocation11 + $0x74] ss:$8 sps:$4 sm:$0xff]  }
 0x846   :  { %1200 = vmax.xlane.f32.xlu1 %v1199_v37  ;;  %v1193_v38 = vpop.f32.mrf.mxu1 }
 0x848   :  { %v2208_v39 = vpop.f32.mrf.mxu1 }
 0x857   :  { %1268 = vrot.lane.b32.xlu1 %v2725_v11, %s2558_s6 }
 0x85b   :  { %852 = vrot.lane.b32.xlu1 %v2027_v45, %s2558_s6 }
 0x85f   :  { %854 = vrot.lane.b32.xlu1 %v2028_v41, %s2558_s6 }
 0x863   :  { %1089 = vrot.lane.b32.xlu1 %v2030_v52, %s2544_s13 }
 0x8c5   :  { %v1198_v42 = vpop.xlane.xlu0 %1197 }
 0x8c6   :  { %v1202_v44 = vsub.f32 %v1141_v18, %v1198_v42 }
 0x8c8   :  { %v1204_v46 = vmul.f32 1.442695, %v1202_v44  ;;  %v2307_v44 = vld [vmem:[#allocation11 + $0x64] ss:$8 sps:$4 sm:$0xff]  }
 0x8ca   :  { %2366 = vpow2.f32 %v1204_v46  ;;  %v2305_v46 = vld [vmem:[#allocation11 + $0x60] ss:$8 sps:$4 sm:$0xff]  }
 0x8cf   :  { %v1201_v47 = vpop.xlane.xlu1 %1200 }
 0x8d0   :  { %v1203_v48 = vsub.f32 %v1191_v33, %v1201_v47  ;;  %v2302_v33 = vld [vmem:[#allocation11 + $0x70] ss:$8 sps:$4 sm:$0xff]  }
 0x8d1   :  { %v2308_v47 = vld [vmem:[#allocation11 + $0x50] ss:$8 sps:$4 sm:$0xff]  }
 0x8d2   :  { %v1206_v11 = vmul.f32 1.442695, %v1203_v48  ;;  %v2311_v48 = vld [vmem:[#allocation11 + $0x40] ss:$8 sps:$4 sm:$0xff]  }
 0x8d3   :  { %v1269_v49 = vpop.permute.xlu1 %1268 }
 0x8d4   :  { %2368 = vpow2.f32 %v1206_v11  ;;  %v1274_v21 = vsel %vm525_vm2, %v1269_v49, 0  ;;  %v2313_v11 = vld [vmem:[#allocation11 + $0x44] ss:$8 sps:$4 sm:$0xff]   ;;  %v2316_v49 = vld [vmem:[#allocation11 + $0x34] ss:$8 sps:$4 sm:$0xff]  }
 0x8d5   :  { %2216 = vmatpush3.bf16.msra.mxu1 %v1274_v21  ;;  %v2314_v21 = vld [vmem:[#allocation11 + $0x30] ss:$8 sps:$4 sm:$0xff]  }
 0x8d6   :  { %1596 = vmatprep.subr.bf16.mxu1 %v2304_v34 }
 0x8d7   :  { %v2367_v50 = vpop.eup %2366  ;;  %v853_v29 = vpop.permute.xlu1 %852 }
 0x8d8   :  { %859 = vst.msk [vmem:[#allocation2] sm:$0xf] %vm858_vm5, %v853_v29  ;;  %v1208_v51 = vsel %vm497_vm3, %v2367_v50, 0.0  ;;  %v2317_v29 = vld [vmem:[#allocation11 + $0x20] ss:$8 sps:$4 sm:$0xff]  }
 0x8d9   :  { %1209 = vadd.xlane.f32.xlu0 %v1208_v51  ;;  %v2322_v51 = vld [vmem:[#allocation11 + $0x14] ss:$8 sps:$4 sm:$0xff]  }
 0x8db   :  { %v855_v53 = vpop.permute.xlu1 %854 }
 0x8dc   :  { %860 = vst.msk [vmem:[#allocation2 + $0x4] sm:$0xf] %vm858_vm5, %v855_v53  ;;  %v2320_v53 = vld [vmem:[#allocation11 + $0x10] ss:$8 sps:$4 sm:$0xff]  }
 0x8df   :  { %v1090_v54 = vpop.permute.xlu1 %1089 }
 0x8e0   :  { %1095 = vst.msk [vmem:[#allocation2 + $0x4] sm:$0xf] %vm1093_vm6, %v1090_v54  ;;  %v2325_v54 = vld [vmem:[#allocation11 + $0x4] ss:$8 sps:$4 sm:$0xff]  }
 0x8e1   :  { %v2369_v55 = vpop.eup %2368 }
 0x8e2   :  { %v1211_v56 = vsel %vm497_vm3, %v2369_v55, 0.0 }
 0x8e3   :  { %1212 = vadd.xlane.f32.xlu0 %v1211_v56 }
 0x8f9   :  { %1220 = vrot.lane.b32.xlu0 %v2693_v40, %s2558_s6 }
 0x8fd   :  { %1087 = vrot.lane.b32.xlu0 %v2029_v57, %s2544_s13 }
 0x962   :  { %v1210_v31 = vpop.xlane.xlu0 %1209 }
 0x963   :  { %2370 = vrcp.f32 %v1210_v31 }
 0x96c   :  { %v1213_v35 = vpop.xlane.xlu0 %1212 }
 0x96d   :  { %2372 = vrcp.f32 %v1213_v35 }
 0x970   :  { %v2371_v58 = vpop.eup %2370  ;;  %v1221_v43 = vpop.permute.xlu0 %1220 }
 0x971   :  { %v1226_v59 = vsel %vm525_vm2, %v1221_v43, 0  ;;  %v1216_v60 = vmul.f32 %v2371_v58, %v2367_v50  ;;  %v2319_v50 = vld [vmem:[#allocation11 + $0x24] ss:$8 sps:$4 sm:$0xff]  }
 0x972   :  { %2210 = vmatpush3.bf16.msra.mxu0 %v1226_v59 }
 0x973   :  { %v1218_v61 = vpack.c.bf16 %v1216_v60, %v1216_v60  ;;  %2221 = vmatprep.subr.bf16.mxu0 %v2555_v1 }
 0x974   :  { %v1088_v62 = vpop.permute.xlu0 %1087 }
 0x975   :  { %1094 = vst.msk [vmem:[#allocation2] sm:$0xf] %vm1093_vm6, %v1088_v62  ;;  %2212 = vmatmul.mubr.msk.bf16.vlgmr.msra.gmra.mxu0 %vm497_vm3, %v1218_v61  ;;  %v1982_v61 = vld [vmem:[%s2905_s8] ss:$0 sm:$0xff] }
 0x976   :  { %2237 = vmatprep.mubr.msk.bf16.mxu0 %vm2556_vm0, %v2555_v1  ;;  %2222 = vmatpush3.bf16.msra.mxu0 %v2293_v3 }
 0x977   :  { %2223 = vmatprep.subr.bf16.mxu0 %v2555_v1 }
 0x97a   :  { %v2373_v40 = vpop.eup %2372  ;;  %2224 = vmatpush3.bf16.msra.mxu0 %v2294_v4 }
 0x97b   :  { %v1217_v63 = vmul.f32 %v2373_v40, %v2369_v55  ;;  %2225 = vmatprep.subr.bf16.mxu0 %v2555_v1  ;;  %v2323_v55 = vld [vmem:[#allocation11] ss:$8 sps:$4 sm:$0xff]  }
 0x97d   :  { %v1219_v2 = vpack.c.bf16 %v1217_v63, %v1217_v63 }
 0x97e   :  { %2226 = vmatpush3.bf16.msra.mxu0 %v2295_v5 }
 0x97f   :  { %2218 = vmatmul.mubr.msk.bf16.vlgmr.msra.gmra.mxu1 %vm497_vm3, %v1219_v2  ;;  %2227 = vmatprep.subr.bf16.mxu0 %v2555_v1  ;;  %v1983_v2 = vld [vmem:[%s2906_s9] ss:$0 sm:$0xff] }
 0x980   :  { %1628 = vmatprep.mubr.bf16.mxu1 %v2554_v0  ;;  %1597 = vmatpush1.bf16.msra.mxu1 %v2302_v33 }
 0x981   :  { %1598 = vmatprep.subr.bf16.mxu1 %v2307_v44 }
 0x982   :  { %2228 = vmatpush3.bf16.msra.mxu0 %v2296_v36 }
 0x983   :  { %2229 = vmatprep.subr.bf16.mxu0 %v2555_v1 }
 0x984   :  { %1599 = vmatpush1.bf16.msra.mxu1 %v2305_v46 }
 0x986   :  { %2230 = vmatpush3.bf16.msra.mxu0 %v2297_v6  ;;  %v2326_v6 = vld [vmem:[#allocation12 + $0x78] sm:$0xff]  }
 0x987   :  { %2231 = vmatprep.subr.bf16.mxu0 %v2555_v1 }
 0x98a   :  { %2232 = vmatpush3.bf16.msra.mxu0 %v2298_v7  ;;  %v2327_v7 = vld [vmem:[#allocation12 + $0x38] sm:$0xff]  }
 0x98b   :  { %2233 = vmatprep.subr.bf16.mxu0 %v2555_v1 }
 0x98e   :  { %2234 = vmatpush3.bf16.msra.mxu0 %v2299_v8  ;;  %v2329_v8 = vld [vmem:[#allocation12 + $0x30] sm:$0xff]  }
 0x98f   :  { %2235 = vmatprep.subr.bf16.mxu0 %v2555_v1 }
 0x992   :  { %2236 = vmatpush3.bf16.msra.mxu0 %v2300_v12  ;;  %v2332_v12 = vld [vmem:[#allocation12 + $0x60] sm:$0xff]  }
 0x993   :  { %2083 = vmatprep.subr.bf16.mxu0 %v2326_v6 }
 0xa35   :  { %v1262_v0 = vpop.f32.mrf.mxu0 }
 0xa36   :  { %v2031_v9 = vpack.c.bf16 %v1262_v0, %v1262_v0  ;;  %v2328_v0 = vld [vmem:[#allocation12 + $0x70] sm:$0xff]  }
 0xa37   :  { %v2213_v10 = vpop.f32.mrf.mxu0 }
 0xa38   :  { %1322 = vrot.lane.b32.xlu0 %v2031_v9, %s2557_s4  ;;  %v2330_v9 = vld [vmem:[#allocation12 + $0x68] sm:$0xff]  }
 0xa39   :  { %v1265_v13 = vpop.f32.mrf.mxu0  ;;  %v2331_v10 = vld [vmem:[#allocation12 + $0x28] sm:$0xff]  }
 0xa3a   :  { %v2333_v13 = vld [vmem:[#allocation12 + $0x20] sm:$0xff]  }
 0xa3b   :  { %v2214_v14 = vpop.f32.mrf.mxu0 }
 0xa3c   :  { %v2334_v14 = vld [vmem:[#allocation12 + $0x58] sm:$0xff]  }
 0xa3f   :  { %v1310_v15 = vpop.f32.mrf.mxu1 }
 0xa40   :  { %v2032_v16 = vpack.c.bf16 %v1310_v15, %v1310_v15  ;;  %v2335_v15 = vld [vmem:[#allocation12 + $0x18] sm:$0xff]  }
 0xa41   :  { %v2219_v17 = vpop.f32.mrf.mxu1 }
 0xa42   :  { %1324 = vrot.lane.b32.xlu1 %v2032_v16, %s2557_s4  ;;  %v2336_v16 = vld [vmem:[#allocation12 + $0x50] sm:$0xff]  }
 0xa43   :  { %v1313_v18 = vpop.f32.mrf.mxu1  ;;  %v2337_v17 = vld [vmem:[#allocation12 + $0x10] sm:$0xff]  }
 0xa44   :  { %v2338_v18 = vld [vmem:[#allocation12 + $0x48] sm:$0xff]  }
 0xa45   :  { %v2220_v19 = vpop.f32.mrf.mxu1 }
 0xa46   :  { %v2339_v19 = vld [vmem:[#allocation12 + $0x8] sm:$0xff]  }
 0xaaa   :  { %v1323_v20 = vpop.permute.xlu0 %1322 }
 0xaab   :  { %1329 = vst.msk [vmem:[#allocation2] sm:$0xf] %vm1328_vm7, %v1323_v20  ;;  %v2340_v20 = vld [vmem:[#allocation12 + $0x40] sm:$0xff]  }
 0xab4   :  { %v1325_v22 = vpop.permute.xlu1 %1324 }
 0xab5   :  { %1330 = vst.msk [vmem:[#allocation2 + $0x4] sm:$0xf] %vm1328_vm7, %v1325_v22  ;;  %v2341_v22 = vld [vmem:[#allocation12] sm:$0xff]  }
 0xabc   :  { %v2301_v25 = vld [vmem:[#allocation2] sm:$0xff]  }
 0xabd   :  { %2238 = vmatmul.mubr.bf16.vlgmr.msra.gmra.mxu0 %v2301_v25  ;;  %v1506_v25 = vlaneseq }
 0xabe   :  { %2084 = vmatpush3.bf16.msra.mxu0 %v2327_v7 }
 0xabf   :  { %2085 = vmatprep.subr.bf16.mxu0 %v2328_v0 }
 0xac2   :  { %2086 = vmatpush3.bf16.msra.mxu0 %v2329_v8 }
 0xac3   :  { %2087 = vmatprep.subr.bf16.mxu0 %v2330_v9 }
 0xac6   :  { %2088 = vmatpush3.bf16.msra.mxu0 %v2331_v10 }
 0xac7   :  { %2089 = vmatprep.subr.bf16.mxu0 %v2332_v12 }
 0xaca   :  { %2090 = vmatpush3.bf16.msra.mxu0 %v2333_v13 }
 0xacb   :  { %2091 = vmatprep.subr.bf16.mxu0 %v2334_v14  ;;  %v2000_v14 = vld [vmem:[%s2904_s7] ss:$0 sm:$0xff] }
 0xace   :  { %2092 = vmatpush3.bf16.msra.mxu0 %v2335_v15 }
 0xacf   :  { %2093 = vmatprep.subr.bf16.mxu0 %v2336_v16 }
 0xad2   :  { %2094 = vmatpush3.bf16.msra.mxu0 %v2337_v17 }
 0xad3   :  { %2095 = vmatprep.subr.bf16.mxu0 %v2338_v18 }
 0xad6   :  { %2096 = vmatpush3.bf16.msra.mxu0 %v2339_v19 }
 0xad7   :  { %2097 = vmatprep.subr.bf16.mxu0 %v2340_v20 }
 0xada   :  { %2098 = vmatpush3.bf16.msra.mxu0 %v2341_v22 }
 0xb7d   :  { %v1437_v26 = vpop.f32.mrf.mxu0 }
 0xb7e   :  { %v1444_v27 = vadd.f32 %v1437_v26, %v2662_v23  ;;  %v1507_v26 = vshrl.u32 %v1506_v25, 7 }
 0xb7f   :  { %v2239_v1 = vpop.f32.mrf.mxu0 }
 0xb80   :  { %1448 = vadd.xlane.f32.xlu0 %v1444_v27  ;;  %v1504_v1 = vld [vmem:[%s2902_s5] sm:$0x3] }
 0xb81   :  { %v1440_v28 = vpop.f32.mrf.mxu0 }
 0xb82   :  { %v1445_v30 = vadd.f32 %v1440_v28, %v2664_v24  ;;  %v2310_v24 = vld [vmem:[#allocation11 + $0x54] ss:$8 sps:$4 sm:$0xff]   ;;  %v1512_v28 = vsub.s32 1, %v1507_v26 }
 0xb83   :  { %v2240_v32 = vpop.f32.mrf.mxu0  ;;  %1600 = vmatprep.subr.bf16.mxu1 %v2310_v24 }
 0xb84   :  { %1450 = vadd.xlane.f32.xlu1 %v1445_v30  ;;  %1601 = vmatpush1.bf16.msra.mxu1 %v2308_v47  ;;  %v1513_v32 = vrot.slane %v1504_v1, %v1512_v28 }
 0xb85   :  { %1602 = vmatprep.subr.bf16.mxu1 %v2313_v11 }
 0xb88   :  { %1603 = vmatpush1.bf16.msra.mxu1 %v2311_v48 }
 0xb89   :  { %1604 = vmatprep.subr.bf16.mxu1 %v2316_v49 }
 0xb8c   :  { %1605 = vmatpush1.bf16.msra.mxu1 %v2314_v21 }
 0xb8d   :  { %1606 = vmatprep.subr.bf16.mxu1 %v2319_v50 }
 0xb90   :  { %1607 = vmatpush1.bf16.msra.mxu1 %v2317_v29 }
 0xb91   :  { %1608 = vmatprep.subr.bf16.mxu1 %v2322_v51 }
 0xb94   :  { %1609 = vmatpush1.bf16.msra.mxu1 %v2320_v53 }
 0xb95   :  { %1610 = vmatprep.subr.bf16.mxu1 %v2325_v54 }
 0xb98   :  { %1611 = vmatpush1.bf16.msra.mxu1 %v2323_v55 }
 0xc09   :  { %v1449_v37 = vpop.xlane.xlu0 %1448 }
 0xc0a   :  { %v1453_v38 = vmul.f32 0.0078125, %v1449_v37 }
 0xc0c   :  { %v1455_v39 = vsub.f32 %v1444_v27, %v1453_v38  ;;  %v1508_v27 = vsub.s32 0, %v1507_v26 }
 0xc0d   :  { %v1451_v45 = vpop.xlane.xlu1 %1450 }
 0xc0e   :  { %v1454_v41 = vmul.f32 0.0078125, %v1451_v45  ;;  %v1457_v52 = vmul.f32 %v1455_v39, %v1455_v39 }
 0xc10   :  { %v1456_v42 = vsub.f32 %v1445_v30, %v1454_v41  ;;  %1459 = vadd.xlane.f32.xlu0 %v1457_v52  ;;  %v1509_v30 = vrot.slane %v1504_v1, %v1508_v27 }
 0xc12   :  { %v1458_v23 = vmul.f32 %v1456_v42, %v1456_v42 }
 0xc14   :  { %1461 = vadd.xlane.f32.xlu0 %v1458_v23 }
 0xc99   :  { %v1460_v56 = vpop.xlane.xlu0 %1459 }
 0xc9a   :  { %v1463_v57 = vmul.f32 0.0078125, %v1460_v56 }
 0xc9c   :  { %v1465_v31 = vadd.f32 1e-05, %v1463_v57 }
 0xc9d   :  { %v1462_v35 = vpop.xlane.xlu0 %1461 }
 0xc9e   :  { %2374 = vrsqrt.f32 %v1465_v31  ;;  %v1464_v58 = vmul.f32 0.0078125, %v1462_v35 }
 0xca0   :  { %v1466_v43 = vadd.f32 1e-05, %v1464_v58 }
 0xca2   :  { %2376 = vrsqrt.f32 %v1466_v43 }
 0xcab   :  { %v2375_v59 = vpop.eup %2374 }
 0xcac   :  { %v1469_v60 = vmul.f32 %v2375_v59, %v1455_v39 }
 0xcae   :  { %v1477_v63 = vmul.f32 %v1982_v61, %v1469_v60 }
 0xcaf   :  { %v2377_v62 = vpop.eup %2376 }
 0xcb0   :  { %v1470_v40 = vmul.f32 %v2377_v62, %v1456_v42  ;;  %v2871_v4 = vadd.f32 %v1983_v2, %v1477_v63 }
 0xcb2   :  { %v1478_v3 = vmul.f32 %v1982_v61, %v1470_v40 }
 0xcb4   :  { %v2873_v5 = vadd.f32 %v1983_v2, %v1478_v3 }
 0xcb6   :  { %v1487_v36 = vpack.c.bf16 %v2873_v5, %v2871_v4 }
 0xcb8   :  { %1629 = vmatmul.mubr.bf16.vlgmr.msra.gmra.mxu1 %v1487_v36 }
 0xd78   :  { %v1630_v33 = vpop.f32.mrf.mxu1 }
 0xd79   :  { %v1631_v34 = vadd.f32 %v1630_v33, %v1509_v30 }
 0xd7a   :  { %v1632_v37 = vpop.f32.mrf.mxu1 }
 0xd7b   :  { %v1639_v38 = vmul.f32 %v1631_v34, %v1631_v34  ;;  %v1633_v39 = vadd.f32 %v1632_v37, %v1513_v32 }
 0xd7c   :  { %v1634_v45 = vpop.f32.mrf.mxu1 }
 0xd7d   :  { %v1643_v41 = vmul.f32 %v1639_v38, %v1631_v34  ;;  %v1640_v52 = vmul.f32 %v1633_v39, %v1633_v39  ;;  %v1635_v42 = vadd.f32 %v1634_v45, %v1509_v30 }
 0xd7e   :  { %v1636_v23 = vpop.f32.mrf.mxu1 }
 0xd7f   :  { %v1647_v44 = vmul.f32 0.044715, %v1643_v41  ;;  %v1644_v46 = vmul.f32 %v1640_v52, %v1633_v39  ;;  %v1641_v24 = vmul.f32 %v1635_v42, %v1635_v42  ;;  %v1637_v47 = vadd.f32 %v1636_v23, %v1513_v32 }
 0xd81   :  { %v1651_v48 = vadd.f32 %v1647_v44, %v1631_v34  ;;  %v1648_v11 = vmul.f32 0.044715, %v1644_v46  ;;  %v1645_v49 = vmul.f32 %v1641_v24, %v1635_v42  ;;  %v1642_v21 = vmul.f32 %v1637_v47, %v1637_v47  ;;  %v2018_v44 = vld [vmem:[%s2908_s11] ss:$0 sm:$0xff] }
 0xd83   :  { %v1655_v50 = vmul.f32 0.7978846, %v1651_v48  ;;  %v1652_v29 = vadd.f32 %v1648_v11, %v1633_v39  ;;  %v1649_v51 = vmul.f32 0.044715, %v1645_v49  ;;  %v1646_v53 = vmul.f32 %v1642_v21, %v1637_v47 }
 0xd85   :  { %v1656_v54 = vmul.f32 0.7978846, %v1652_v29  ;;  %v1653_v55 = vadd.f32 %v1649_v51, %v1635_v42  ;;  %v1650_v56 = vmul.f32 0.044715, %v1646_v53  ;;  %2378 = vtanh.f32 %v1655_v50 }
 0xd87   :  { %2380 = vtanh.f32 %v1656_v54  ;;  %v1657_v57 = vmul.f32 0.7978846, %v1653_v55  ;;  %v1654_v31 = vadd.f32 %v1650_v56, %v1637_v47 }
 0xd89   :  { %2382 = vtanh.f32 %v1657_v57  ;;  %v1658_v35 = vmul.f32 0.7978846, %v1654_v31 }
 0xd8b   :  { %2384 = vtanh.f32 %v1658_v35 }
 0xd92   :  { %v2379_v58 = vpop.eup %2378 }
 0xd93   :  { %v1663_v61 = vadd.f32 1.0, %v2379_v58 }
 0xd94   :  { %v2381_v43 = vpop.eup %2380 }
 0xd95   :  { %v1664_v59 = vadd.f32 1.0, %v2381_v43  ;;  %v1667_v36 = vmul.f32 0.5, %v1663_v61 }
 0xd96   :  { %v2383_v60 = vpop.eup %2382 }
 0xd97   :  { %v1665_v62 = vadd.f32 1.0, %v2383_v60  ;;  %v1668_v3 = vmul.f32 0.5, %v1664_v59  ;;  %v1671_v9 = vmul.f32 %v1667_v36, %v1631_v34 }
 0xd98   :  { %v2385_v40 = vpop.eup %2384 }
 0xd99   :  { %v1669_v63 = vmul.f32 0.5, %v1665_v62  ;;  %v1666_v2 = vadd.f32 1.0, %v2385_v40  ;;  %v1672_v0 = vmul.f32 %v1668_v3, %v1633_v39 }
 0xd9b   :  { %v1670_v6 = vmul.f32 0.5, %v1666_v2  ;;  %v1673_v7 = vmul.f32 %v1669_v63, %v1635_v42  ;;  %v2017_v42 = vld [vmem:[%s2907_s10] ss:$0 sm:$0xff] }
 0xd9d   :  { %v1674_v8 = vmul.f32 %v1670_v6, %v1637_v47  ;;  %v1675_v12 = vpack.c.bf16 %v1673_v7, %v1671_v9 }
 0xd9f   :  { %v1676_v10 = vpack.c.bf16 %v1674_v8, %v1672_v0 }
 0xda1   :  { %1844 = vmatprep.mubr.bf16.mxu0 %v1676_v10 }
 0xda2   :  { %1845 = vmatmul.mubr.bf16.vlgmr.msra.gmra.mxu0 %v1675_v12 }
 0xe62   :  { %v2099_v13 = vpop.f32.mrf.mxu0 }
 0xe64   :  { %v2100_v15 = vpop.f32.mrf.mxu0 }
 0xe65   :  { %v2101_v16 = vadd.f32 %v2100_v15, %v2099_v13 }
 0xe66   :  { %v2102_v17 = vpop.f32.mrf.mxu0 }
 0xe67   :  { %v1847_v18 = vadd.f32 %v2101_v16, %v2000_v14 }
 0xe68   :  { %v2103_v19 = vpop.f32.mrf.mxu0 }
 0xe69   :  { %v2104_v20 = vadd.f32 %v2103_v19, %v2102_v17  ;;  %v1853_v22 = vadd.f32 %v1847_v18, %v2871_v4 }
 0xe6b   :  { %v1850_v25 = vadd.f32 %v2104_v20, %v2000_v14  ;;  %1857 = vadd.xlane.f32.xlu0 %v1853_v22 }
 0xe6d   :  { %v1854_v26 = vadd.f32 %v1850_v25, %v2873_v5 }
 0xe6f   :  { %1859 = vadd.xlane.f32.xlu1 %v1854_v26 }
 0xef4   :  { %v1858_v27 = vpop.xlane.xlu0 %1857 }
 0xef5   :  { %v1861_v1 = vmul.f32 0.0078125, %v1858_v27 }
 0xef7   :  { %v1863_v28 = vsub.f32 %v1853_v22, %v1861_v1 }
 0xef8   :  { %v1860_v30 = vpop.xlane.xlu1 %1859 }
 0xef9   :  { %v1862_v32 = vmul.f32 0.0078125, %v1860_v30  ;;  %v1865_v33 = vmul.f32 %v1863_v28, %v1863_v28 }
 0xefb   :  { %v1864_v34 = vsub.f32 %v1854_v26, %v1862_v32  ;;  %1867 = vadd.xlane.f32.xlu0 %v1865_v33 }
 0xefd   :  { %v1866_v37 = vmul.f32 %v1864_v34, %v1864_v34 }
 0xeff   :  { %1869 = vadd.xlane.f32.xlu1 %v1866_v37 }
 0xf84   :  { %v1868_v38 = vpop.xlane.xlu0 %1867 }
 0xf85   :  { %v1871_v39 = vmul.f32 0.0078125, %v1868_v38 }
 0xf87   :  { %v1873_v45 = vadd.f32 1e-05, %v1871_v39 }
 0xf88   :  { %v1870_v41 = vpop.xlane.xlu1 %1869 }
 0xf89   :  { %2386 = vrsqrt.f32 %v1873_v45  ;;  %v1872_v4 = vmul.f32 0.0078125, %v1870_v41 }
 0xf8b   :  { %v1874_v52 = vadd.f32 1e-05, %v1872_v4 }
 0xf8d   :  { %2388 = vrsqrt.f32 %v1874_v52 }
 0xf96   :  { %v2387_v5 = vpop.eup %2386 }
 0xf97   :  { %v1877_v23 = vmul.f32 %v2387_v5, %v1863_v28 }
 0xf99   :  { %v1885_v46 = vmul.f32 %v2017_v42, %v1877_v23 }
 0xf9a   :  { %v2389_v24 = vpop.eup %2388 }
 0xf9b   :  { %v1878_v47 = vmul.f32 %v2389_v24, %v1864_v34  ;;  %v1893_v48 = vadd.f32 %v2018_v44, %v1885_v46 }
 0xf9d   :  { %v1886_v11 = vmul.f32 %v2017_v42, %v1878_v47  ;;  %1895 = vst [vmem:[#allocation14] sm:$0xff] %v1893_v48 }
 0xf9f   :  { %v1894_v49 = vadd.f32 %v2018_v44, %v1886_v11 }
 0xfa1   :  { %1896 = vst [vmem:[#allocation14 + $0x8] sm:$0xff] %v1894_v49 }
 0xfa2   :  { %2521 = shalt.err (!%p2518_p6)
}
 0xfa3   :  { %1908 = dma.vmem_to_hbm [thread:$0]  %s1903_s28, 256, %s2909_s12, [#allocation5], %s2547_s19, %s2547_s19, %s2548_s20  }
 0xfa4   :  { %2538 = dma.done.wait [#allocation5], 256  }
 0xfa5   :  { %2539 = vsyncadd [#allocation5], 4294967040 }
 0xfa6   :  { %1912 = vsyncpa [#allocation4], 1 }
 0xfa7   :  { %1913 = vsyncpa [#allocation7], 1 }
 0xfa8   :  { %1914 = vsyncpa [#allocation10], 1 }
 0xfa9   :  { %1915 = vsyncpa [#allocation13], 1 }
 0xfaa   :  { %1916 = vsyncpa [#allocation5], 1 }

</bundles_post_ra>
